<compile_context>
chip_gen: v7x
topology: tpu7x:2x2x1
jax: 0.10.0
libtpu: 0.0.40
codegen_flags: <defaults>
</compile_context>

<pallas_src>
import functools
import math

import jax
import jax.numpy as jnp
from jax import lax
from jax.experimental import pallas as pl
from jax.experimental.pallas import tpu as pltpu

NEG_INF = -1e9


def _decoder_layer_kernel(
    src_len_ref,                    # SMEM (B,) int32   (scalar prefetch)
    x_ref,                          # (1, TQ, D)  f32   query / residual tile
    xfull_ref,                      # (1, S_t, D) f32   full target seq (self-attn K/V)
    mem_ref,                        # (1, S_s, D) bf16  encoder memory (src-attn K/V)
    ln_a_ref, ln_b_ref,             # (3, D) f32 each
    self_w_ref, self_b_ref,         # (4, D, D) bf16, (4, D) f32
    src_w_ref, src_b_ref,           # (4, D, D) bf16, (4, D) f32
    ff_w1_ref, ff_b1_ref,           # (D, d_ff) bf16, (1, d_ff) f32
    ff_w2_ref, ff_b2_ref,           # (d_ff, D) bf16, (1, D) f32
    out_ref,                        # (1, TQ, D) f32
    heads_acc,                      # VMEM scratch (TQ, D) f32
    *, n_heads, eps):
  b = pl.program_id(0)
  qi = pl.program_id(1)

  x = x_ref[0].astype(jnp.float32)            # (TQ, D)
  x_full = xfull_ref[0].astype(jnp.float32)   # (S_t, D)
  mem = mem_ref[0]                            # (S_s, D) bf16

  TQ, D = x.shape
  S_t = x_full.shape[0]
  S_s = mem.shape[0]
  d_k = D // n_heads
  inv_sqrt_dk = 1.0 / math.sqrt(d_k)

  # ---- masks generated in-kernel (no O(S^2) HBM mask traffic) ----------------
  # Causal (subsequent-position) mask for self-attention.
  q_pos = qi * TQ + lax.broadcasted_iota(jnp.int32, (TQ, S_t), 0)
  k_pos = lax.broadcasted_iota(jnp.int32, (TQ, S_t), 1)
  tgt_bias = jnp.where(k_pos <= q_pos, 0.0, NEG_INF).astype(jnp.float32)
  # Padding mask for encoder-decoder attention from per-batch key length (SMEM).
  src_len = src_len_ref[b]
  s_pos = lax.broadcasted_iota(jnp.int32, (TQ, S_s), 1)
  src_bias = jnp.where(s_pos < src_len, 0.0, NEG_INF).astype(jnp.float32)

  def layer_norm(v, idx):
    # torch:  a * (x - mean) / (x.std(-1) + eps) + b   (std is unbiased)
    a = ln_a_ref[idx:idx + 1, :]            # (1, D)
    bb = ln_b_ref[idx:idx + 1, :]           # (1, D)
    mean = jnp.mean(v, axis=-1, keepdims=True)
    var = jnp.sum((v - mean) ** 2, axis=-1, keepdims=True) * (1.0 / (D - 1))
    inv = pl.reciprocal(jnp.sqrt(var) + eps, approx=True)   # EUP, frees VALU
    return a * (v - mean) * inv + bb

  def attention(q_in, kv_in, bias, w_ref, b_ref):
    # q_in: (TQ, D) bf16, kv_in: (S_k, D) bf16, bias: (TQ, S_k) f32 additive mask.
    q = jnp.dot(q_in, w_ref[0], preferred_element_type=jnp.float32) + b_ref[0:1, :]
    k = jnp.dot(kv_in, w_ref[1], preferred_element_type=jnp.float32) + b_ref[1:2, :]
    v = jnp.dot(kv_in, w_ref[2], preferred_element_type=jnp.float32) + b_ref[2:3, :]
    q = (q * inv_sqrt_dk).astype(jnp.bfloat16)   # fold 1/sqrt(d_k) into q once
    k = k.astype(jnp.bfloat16)
    v = v.astype(jnp.bfloat16)
    for h in range(n_heads):                     # static, unrolled
      lo = h * d_k
      qh = q[:, lo:lo + d_k]                     # (TQ, d_k)
      kh = k[:, lo:lo + d_k]                     # (S_k, d_k)
      vh = v[:, lo:lo + d_k]                     # (S_k, d_k)
      # q @ k^T without an explicit transpose (NT dot_general), f32 accumulate.
      s = lax.dot_general(qh, kh, (((1,), (1,)), ((), ())),
                          preferred_element_type=jnp.float32)       # (TQ, S_k)
      s = s + bias
      s = s - jnp.max(s, axis=-1, keepdims=True)
      p = jnp.exp(s)
      p = p * pl.reciprocal(jnp.sum(p, axis=-1, keepdims=True), approx=True)
      oh = jnp.dot(p.astype(jnp.bfloat16), vh,
                   preferred_element_type=jnp.float32)               # (TQ, d_k)
      heads_acc[:, lo:lo + d_k] = oh             # "concat" heads into VMEM scratch
    heads = heads_acc[...].astype(jnp.bfloat16)  # (TQ, D)
    # Single full-K output projection (replaces H K=d_k matmuls).
    return jnp.dot(heads, w_ref[3], preferred_element_type=jnp.float32) + b_ref[3:4, :]

  # TODO(synk): nn.Dropout has no effect in eval/inference mode — identity here.

  # sublayer[0]: pre-norm causal self-attention + residual
  nx_q = layer_norm(x, 0).astype(jnp.bfloat16)
  nx_kv = layer_norm(x_full, 0).astype(jnp.bfloat16)
  x = x + attention(nx_q, nx_kv, tgt_bias, self_w_ref, self_b_ref)

  # sublayer[1]: pre-norm encoder-decoder (src) attention + residual
  nx = layer_norm(x, 1).astype(jnp.bfloat16)
  x = x + attention(nx, mem, src_bias, src_w_ref, src_b_ref)

  # sublayer[2]: pre-norm position-wise feed-forward + residual
  nx = layer_norm(x, 2).astype(jnp.bfloat16)
  hdn = jnp.dot(nx, ff_w1_ref[...], preferred_element_type=jnp.float32) + ff_b1_ref[...]
  hdn = jnp.maximum(hdn, 0.0).astype(jnp.bfloat16)
  ff = jnp.dot(hdn, ff_w2_ref[...], preferred_element_type=jnp.float32) + ff_b2_ref[...]
  x = x + ff

  out_ref[0] = x.astype(out_ref.dtype)


def decoder_layer_forward(x, memory, src_lens, params, *, n_heads, eps=1e-6,
                          q_tile=128):
  """x: (B, S_t, D) f32, memory: (B, S_s, D), src_lens: (B,) int32 valid memory
  lengths (padding mask).  Self-attention uses the standard causal mask.
  Returns (B, S_t, D)."""
  (ln_a, ln_b, self_w, self_b, src_w, src_b,
   ff_w1, ff_b1, ff_w2, ff_b2) = params

  B, S_t, D = x.shape
  S_s = memory.shape[1]
  d_ff = ff_w1.shape[1]
  assert D % n_heads == 0

  tq = min(q_tile, S_t)
  assert S_t % tq == 0, "target sequence length must be divisible by the query tile"
  grid = (B, S_t // tq)

  # bf16 weights / memory: half the DMA + VMEM footprint, 2x MXU throughput;
  # accumulation stays f32 in-kernel. Biases / LN params / residuals stay f32.
  mem_bf = memory.astype(jnp.bfloat16)
  self_w_bf = self_w.astype(jnp.bfloat16)
  src_w_bf = src_w.astype(jnp.bfloat16)
  ff_w1_bf = ff_w1.astype(jnp.bfloat16)
  ff_w2_bf = ff_w2.astype(jnp.bfloat16)
  src_lens = src_lens.astype(jnp.int32)

  kernel = functools.partial(_decoder_layer_kernel, n_heads=n_heads, eps=eps)

  def full(*shape):
    # Whole-array, VMEM-resident block with a constant index map.
    zeros = (0,) * len(shape)
    return pl.BlockSpec(shape, lambda bb, qq, lens, zeros=zeros: zeros)

  grid_spec = pltpu.PrefetchScalarGridSpec(
      num_scalar_prefetch=1,                 # src_lens -> SMEM
      grid=grid,
      in_specs=[
          pl.BlockSpec((1, tq, D), lambda bb, qq, lens: (bb, qq, 0)),   # x (q tile)
          pl.BlockSpec((1, S_t, D), lambda bb, qq, lens: (bb, 0, 0)),   # x (full, self K/V)
          pl.BlockSpec((1, S_s, D), lambda bb, qq, lens: (bb, 0, 0)),   # memory
          full(3, D), full(3, D),                                       # LayerNorm a/b
          full(4, D, D), full(4, D),                                    # self-attn W, b
          full(4, D, D), full(4, D),                                    # src-attn  W, b
          full(D, d_ff), full(1, d_ff),                                 # FFN W1, b1
          full(d_ff, D), full(1, D),                                    # FFN W2, b2
      ],
      out_specs=pl.BlockSpec((1, tq, D), lambda bb, qq, lens: (bb, qq, 0)),
      scratch_shapes=[pltpu.VMEM((tq, D), jnp.float32)],                # head concat
  )

  return pl.pallas_call(
      kernel,
      out_shape=jax.ShapeDtypeStruct((B, S_t, D), x.dtype),
      grid_spec=grid_spec,
      compiler_params=pltpu.CompilerParams(
          # batch x query-tile both parallel -> feeds both v7x TensorCores.
          dimension_semantics=("parallel", "parallel"),
          # Above v5e(16MiB)/v6e/v7x(32MiB) scoped defaults, under v7x 64MiB physical.
          vmem_limit_bytes=48 * 1024 * 1024),
  )(src_lens, x, x, mem_bf,
    ln_a, ln_b, self_w_bf, self_b, src_w_bf, src_b,
    ff_w1_bf, ff_b1, ff_w2_bf, ff_b2)


def _reference(x, memory, src_lens, params, n_heads, eps):
  """Plain-JAX f32 reference mirroring the PyTorch module's math exactly."""
  (ln_a, ln_b, self_w, self_b, src_w, src_b,
   ff_w1, ff_b1, ff_w2, ff_b2) = params
  B, S_t, D = x.shape
  S_s = memory.shape[1]
  d_k = D // n_heads

  tgt_mask = jnp.broadcast_to(jnp.tril(jnp.ones((S_t, S_t), jnp.float32))[None],
                              (B, S_t, S_t))
  src_mask = (jnp.arange(S_s)[None, None, :]
              < src_lens[:, None, None]).astype(jnp.float32)
  src_mask = jnp.broadcast_to(src_mask, (B, S_t, S_s))

  def layer_norm(v, i):
    mean = v.mean(-1, keepdims=True)
    std = jnp.sqrt(((v - mean) ** 2).sum(-1, keepdims=True) / (D - 1))
    return ln_a[i] * (v - mean) / (std + eps) + ln_b[i]

  def mha(q_in, kv_in, mask, w, b):
    Bq, S_q, _ = q_in.shape
    S_k = kv_in.shape[1]
    q = (q_in @ w[0] + b[0]).reshape(Bq, S_q, n_heads, d_k).transpose(0, 2, 1, 3)
    k = (kv_in @ w[1] + b[1]).reshape(Bq, S_k, n_heads, d_k).transpose(0, 2, 1, 3)
    v = (kv_in @ w[2] + b[2]).reshape(Bq, S_k, n_heads, d_k).transpose(0, 2, 1, 3)
    scores = jnp.einsum("bhqd,bhkd->bhqk", q, k) / math.sqrt(d_k)
    scores = jnp.where(mask[:, None, :, :] > 0.5, scores, -1e9)
    p = jax.nn.softmax(scores, axis=-1)
    o = jnp.einsum("bhqk,bhkd->bhqd", p, v).transpose(0, 2, 1, 3).reshape(Bq, S_q, D)
    return o @ w[3] + b[3]

  nx = layer_norm(x, 0)
  x = x + mha(nx, nx, tgt_mask, self_w, self_b)
  nx = layer_norm(x, 1)
  x = x + mha(nx, memory, src_mask, src_w, src_b)
  nx = layer_norm(x, 2)
  ff = jnp.maximum(nx @ ff_w1 + ff_b1, 0.0) @ ff_w2 + ff_b2
  return x + ff


if __name__ == "__main__":
  # Small deterministic config consistent with the module.
  B, S_T, S_S = 2, 8, 16          # batch, target seq, source (memory) seq
  D, N_HEADS, D_FF = 32, 4, 64    # d_model, heads, feed-forward hidden
  EPS = 1e-6

  key = jax.random.PRNGKey(0)
  ks = jax.random.split(key, 12)

  x = jax.random.normal(ks[0], (B, S_T, D), jnp.float32)
  memory = jax.random.normal(ks[1], (B, S_S, D), jnp.float32)

  # Self-attention mask: causal.  Source mask: padding, given as per-batch valid
  # memory lengths (batch 1 has its last 3 memory positions masked out).
  src_lens = jnp.array([S_S, S_S - 3], jnp.int32)

  # Deterministic "pre-learned" parameters (stand-ins for nn.Parameter weights).
  w_scale = 1.0 / math.sqrt(D)
  ln_a = 1.0 + 0.1 * jax.random.normal(ks[2], (3, D), jnp.float32)
  ln_b = 0.1 * jax.random.normal(ks[3], (3, D), jnp.float32)
  self_w = jax.random.normal(ks[4], (4, D, D), jnp.float32) * w_scale
  self_b = 0.1 * jax.random.normal(ks[5], (4, D), jnp.float32)
  src_w = jax.random.normal(ks[6], (4, D, D), jnp.float32) * w_scale
  src_b = 0.1 * jax.random.normal(ks[7], (4, D), jnp.float32)
  ff_w1 = jax.random.normal(ks[8], (D, D_FF), jnp.float32) * w_scale
  ff_b1 = 0.1 * jax.random.normal(ks[9], (1, D_FF), jnp.float32)
  ff_w2 = jax.random.normal(ks[10], (D_FF, D), jnp.float32) * (1.0 / math.sqrt(D_FF))
  ff_b2 = 0.1 * jax.random.normal(ks[11], (1, D), jnp.float32)

  params = (ln_a, ln_b, self_w, self_b, src_w, src_b,
            ff_w1, ff_b1, ff_w2, ff_b2)

  out = decoder_layer_forward(x, memory, src_lens, params,
                              n_heads=N_HEADS, eps=EPS)
  out = jax.block_until_ready(out)

  ref = _reference(x, memory, src_lens, params, N_HEADS, EPS)
  assert out.shape == (B, S_T, D)
  max_err = float(jnp.max(jnp.abs(out - ref)))
  # bf16 matmul operands + approximate reciprocals vs. an f32 reference:
  # compare at bf16-level tolerance.
  assert jnp.allclose(out, ref, atol=5e-2, rtol=5e-2), max_err

  print("KERNEL_OK")
</pallas_src>

<mosaic_0001>
module attributes {stable_mosaic.version = 11 : i64} {
  func.func @_decoder_layer_kernel(%arg0: i32, %arg1: i32, %arg2: memref<2xi32, #tpu.memory_space<smem>>, %arg3: memref<1x8x32xf32, #tpu.memory_space<vmem>>, %arg4: memref<1x8x32xf32, #tpu.memory_space<vmem>>, %arg5: memref<1x16x32xbf16, #tpu.memory_space<vmem>>, %arg6: memref<3x32xf32, #tpu.memory_space<vmem>>, %arg7: memref<3x32xf32, #tpu.memory_space<vmem>>, %arg8: memref<4x32x32xbf16, #tpu.memory_space<vmem>>, %arg9: memref<4x32xf32, #tpu.memory_space<vmem>>, %arg10: memref<4x32x32xbf16, #tpu.memory_space<vmem>>, %arg11: memref<4x32xf32, #tpu.memory_space<vmem>>, %arg12: memref<32x64xbf16, #tpu.memory_space<vmem>>, %arg13: memref<1x64xf32, #tpu.memory_space<vmem>>, %arg14: memref<64x32xbf16, #tpu.memory_space<vmem>>, %arg15: memref<1x32xf32, #tpu.memory_space<vmem>>, %arg16: memref<1x8x32xf32, #tpu.memory_space<vmem>>, %arg17: memref<8x32xf32, #tpu.memory_space<vmem>>) attributes {dimension_semantics = [#tpu.dimension_semantics<parallel>, #tpu.dimension_semantics<parallel>], iteration_bounds = array<i64: 2, 1>, scalar_prefetch = 1 : i64, scratch_operands = 1 : i64, tpu.core_type = #tpu.core_type<tc>, window_params = [{transform_indices = @transform_0, window_bounds = array<i64: 1, 8, 32>}, {transform_indices = @transform_1, window_bounds = array<i64: 1, 8, 32>}, {transform_indices = @transform_2, window_bounds = array<i64: 1, 16, 32>}, {pipeline_mode = #tpu.pipeline_mode<synchronous>, transform_indices = @transform_3, window_bounds = array<i64: 3, 32>}, {pipeline_mode = #tpu.pipeline_mode<synchronous>, transform_indices = @transform_4, window_bounds = array<i64: 3, 32>}, {pipeline_mode = #tpu.pipeline_mode<synchronous>, transform_indices = @transform_5, window_bounds = array<i64: 4, 32, 32>}, {pipeline_mode = #tpu.pipeline_mode<synchronous>, transform_indices = @transform_6, window_bounds = array<i64: 4, 32>}, {pipeline_mode = #tpu.pipeline_mode<synchronous>, transform_indices = @transform_7, window_bounds = array<i64: 4, 32, 32>}, {pipeline_mode = #tpu.pipeline_mode<synchronous>, transform_indices = @transform_8, window_bounds = array<i64: 4, 32>}, {pipeline_mode = #tpu.pipeline_mode<synchronous>, transform_indices = @transform_9, window_bounds = array<i64: 32, 64>}, {pipeline_mode = #tpu.pipeline_mode<synchronous>, transform_indices = @transform_10, window_bounds = array<i64: 1, 64>}, {pipeline_mode = #tpu.pipeline_mode<synchronous>, transform_indices = @transform_11, window_bounds = array<i64: 64, 32>}, {pipeline_mode = #tpu.pipeline_mode<synchronous>, transform_indices = @transform_12, window_bounds = array<i64: 1, 32>}, {transform_indices = @transform_13, window_bounds = array<i64: 1, 8, 32>}]} {
    %c0 = arith.constant 0 : index
    %c0_0 = arith.constant 0 : index
    %c0_1 = arith.constant 0 : index
    %0 = vector.load %arg3[%c0, %c0_0, %c0_1] : memref<1x8x32xf32, #tpu.memory_space<vmem>>, vector<1x8x32xf32>
    %1 = vector.shape_cast %0 : vector<1x8x32xf32> to vector<8x32xf32>
    %c0_2 = arith.constant 0 : index
    %c0_3 = arith.constant 0 : index
    %c0_4 = arith.constant 0 : index
    %2 = vector.load %arg4[%c0_2, %c0_3, %c0_4] : memref<1x8x32xf32, #tpu.memory_space<vmem>>, vector<1x8x32xf32>
    %3 = vector.shape_cast %2 : vector<1x8x32xf32> to vector<8x32xf32>
    %c0_5 = arith.constant 0 : index
    %c0_6 = arith.constant 0 : index
    %c0_7 = arith.constant 0 : index
    %4 = vector.load %arg5[%c0_5, %c0_6, %c0_7] : memref<1x16x32xbf16, #tpu.memory_space<vmem>>, vector<1x16x32xbf16>
    %5 = vector.shape_cast %4 : vector<1x16x32xbf16> to vector<16x32xbf16>
    %c8_i32 = arith.constant 8 : i32
    %6 = arith.muli %arg1, %c8_i32 : i32
    %7 = tpu.iota {dimensions = array<i32: 0>} : vector<8x8xi32>
    %8 = vector.broadcast %6 : i32 to vector<8x8xi32>
    %9 = arith.addi %8, %7 : vector<8x8xi32>
    %10 = tpu.iota {dimensions = array<i32: 1>} : vector<8x8xi32>
    %11 = arith.cmpi sle, %10, %9 : vector<8x8xi32>
    %cst = arith.constant 0.000000e+00 : f32
    %cst_8 = arith.constant -1.000000e+09 : f32
    %12 = vector.broadcast %cst : f32 to vector<8x8xf32>
    %13 = vector.broadcast %cst_8 : f32 to vector<8x8xf32>
    %14 = arith.select %11, %12, %13 : vector<8x8xi1>, vector<8x8xf32>
    %15 = arith.index_cast %arg0 : i32 to index
    %16 = memref.load %arg2[%15] : memref<2xi32, #tpu.memory_space<smem>>
    %17 = tpu.iota {dimensions = array<i32: 1>} : vector<8x16xi32>
    %18 = vector.broadcast %16 : i32 to vector<8x16xi32>
    %19 = arith.cmpi slt, %17, %18 : vector<8x16xi32>
    %cst_9 = arith.constant 0.000000e+00 : f32
    %cst_10 = arith.constant -1.000000e+09 : f32
    %20 = vector.broadcast %cst_9 : f32 to vector<8x16xf32>
    %21 = vector.broadcast %cst_10 : f32 to vector<8x16xf32>
    %22 = arith.select %19, %20, %21 : vector<8x16xi1>, vector<8x16xf32>
    %c0_11 = arith.constant 0 : index
    %c0_12 = arith.constant 0 : index
    %23 = vector.load %arg6[%c0_11, %c0_12] : memref<3x32xf32, #tpu.memory_space<vmem>>, vector<1x32xf32>
    %c0_13 = arith.constant 0 : index
    %c0_14 = arith.constant 0 : index
    %24 = vector.load %arg7[%c0_13, %c0_14] : memref<3x32xf32, #tpu.memory_space<vmem>>, vector<1x32xf32>
    %cst_15 = arith.constant dense<0.000000e+00> : vector<8xf32>
    %25 = vector.multi_reduction <add>, %1, %cst_15 [1] : vector<8x32xf32> to vector<8xf32>
    %26 = vector.shape_cast %25 : vector<8xf32> to vector<8x1xf32>
    %cst_16 = arith.constant 3.200000e+01 : f32
    %27 = vector.broadcast %cst_16 : f32 to vector<8x1xf32>
    %28 = arith.divf %26, %27 : vector<8x1xf32>
    %29 = vector.broadcast %28 : vector<8x1xf32> to vector<8x32xf32>
    %30 = arith.subf %1, %29 : vector<8x32xf32>
    %31 = arith.mulf %30, %30 : vector<8x32xf32>
    %cst_17 = arith.constant dense<0.000000e+00> : vector<8xf32>
    %32 = vector.multi_reduction <add>, %31, %cst_17 [1] : vector<8x32xf32> to vector<8xf32>
    %33 = vector.shape_cast %32 : vector<8xf32> to vector<8x1xf32>
    %cst_18 = arith.constant 0.0322580636 : f32
    %34 = vector.broadcast %cst_18 : f32 to vector<8x1xf32>
    %35 = arith.mulf %33, %34 : vector<8x1xf32>
    %36 = math.sqrt %35 : vector<8x1xf32>
    %cst_19 = arith.constant 9.99999997E-7 : f32
    %37 = vector.broadcast %cst_19 : f32 to vector<8x1xf32>
    %38 = arith.addf %36, %37 : vector<8x1xf32>
    %39 = tpu.reciprocal %38 {approx = true} : vector<8x1xf32> -> vector<8x1xf32>
    %40 = vector.broadcast %28 : vector<8x1xf32> to vector<8x32xf32>
    %41 = arith.subf %1, %40 : vector<8x32xf32>
    %42 = vector.broadcast %23 : vector<1x32xf32> to vector<8x32xf32>
    %43 = arith.mulf %42, %41 : vector<8x32xf32>
    %44 = vector.broadcast %39 : vector<8x1xf32> to vector<8x32xf32>
    %45 = arith.mulf %43, %44 : vector<8x32xf32>
    %46 = vector.broadcast %24 : vector<1x32xf32> to vector<8x32xf32>
    %47 = arith.addf %45, %46 : vector<8x32xf32>
    %48 = arith.truncf %47 : vector<8x32xf32> to vector<8x32xbf16>
    %c0_20 = arith.constant 0 : index
    %c0_21 = arith.constant 0 : index
    %49 = vector.load %arg6[%c0_20, %c0_21] : memref<3x32xf32, #tpu.memory_space<vmem>>, vector<1x32xf32>
    %c0_22 = arith.constant 0 : index
    %c0_23 = arith.constant 0 : index
    %50 = vector.load %arg7[%c0_22, %c0_23] : memref<3x32xf32, #tpu.memory_space<vmem>>, vector<1x32xf32>
    %cst_24 = arith.constant dense<0.000000e+00> : vector<8xf32>
    %51 = vector.multi_reduction <add>, %3, %cst_24 [1] : vector<8x32xf32> to vector<8xf32>
    %52 = vector.shape_cast %51 : vector<8xf32> to vector<8x1xf32>
    %cst_25 = arith.constant 3.200000e+01 : f32
    %53 = vector.broadcast %cst_25 : f32 to vector<8x1xf32>
    %54 = arith.divf %52, %53 : vector<8x1xf32>
    %55 = vector.broadcast %54 : vector<8x1xf32> to vector<8x32xf32>
    %56 = arith.subf %3, %55 : vector<8x32xf32>
    %57 = arith.mulf %56, %56 : vector<8x32xf32>
    %cst_26 = arith.constant dense<0.000000e+00> : vector<8xf32>
    %58 = vector.multi_reduction <add>, %57, %cst_26 [1] : vector<8x32xf32> to vector<8xf32>
    %59 = vector.shape_cast %58 : vector<8xf32> to vector<8x1xf32>
    %cst_27 = arith.constant 0.0322580636 : f32
    %60 = vector.broadcast %cst_27 : f32 to vector<8x1xf32>
    %61 = arith.mulf %59, %60 : vector<8x1xf32>
    %62 = math.sqrt %61 : vector<8x1xf32>
    %cst_28 = arith.constant 9.99999997E-7 : f32
    %63 = vector.broadcast %cst_28 : f32 to vector<8x1xf32>
    %64 = arith.addf %62, %63 : vector<8x1xf32>
    %65 = tpu.reciprocal %64 {approx = true} : vector<8x1xf32> -> vector<8x1xf32>
    %66 = vector.broadcast %54 : vector<8x1xf32> to vector<8x32xf32>
    %67 = arith.subf %3, %66 : vector<8x32xf32>
    %68 = vector.broadcast %49 : vector<1x32xf32> to vector<8x32xf32>
    %69 = arith.mulf %68, %67 : vector<8x32xf32>
    %70 = vector.broadcast %65 : vector<8x1xf32> to vector<8x32xf32>
    %71 = arith.mulf %69, %70 : vector<8x32xf32>
    %72 = vector.broadcast %50 : vector<1x32xf32> to vector<8x32xf32>
    %73 = arith.addf %71, %72 : vector<8x32xf32>
    %74 = arith.truncf %73 : vector<8x32xf32> to vector<8x32xbf16>
    %c0_29 = arith.constant 0 : index
    %c0_30 = arith.constant 0 : index
    %c0_31 = arith.constant 0 : index
    %75 = vector.load %arg8[%c0_29, %c0_30, %c0_31] : memref<4x32x32xbf16, #tpu.memory_space<vmem>>, vector<1x32x32xbf16>
    %76 = vector.shape_cast %75 : vector<1x32x32xbf16> to vector<32x32xbf16>
    %cst_32 = arith.constant dense<0.000000e+00> : vector<8x32xf32>
    %77 = tpu.matmul %48, %76, %cst_32 {dimension_numbers = #tpu.dot_dimension_numbers<[1], [0], [0], [1], [0, 0, 1, 1], [], []>} : vector<8x32xbf16>, vector<32x32xbf16>, vector<8x32xf32> -> vector<8x32xf32>
    %c0_33 = arith.constant 0 : index
    %c0_34 = arith.constant 0 : index
    %78 = vector.load %arg9[%c0_33, %c0_34] : memref<4x32xf32, #tpu.memory_space<vmem>>, vector<1x32xf32>
    %79 = vector.broadcast %78 : vector<1x32xf32> to vector<8x32xf32>
    %80 = arith.addf %77, %79 : vector<8x32xf32>
    %c1 = arith.constant 1 : index
    %c0_35 = arith.constant 0 : index
    %c0_36 = arith.constant 0 : index
    %81 = vector.load %arg8[%c1, %c0_35, %c0_36] : memref<4x32x32xbf16, #tpu.memory_space<vmem>>, vector<1x32x32xbf16>
    %82 = vector.shape_cast %81 : vector<1x32x32xbf16> to vector<32x32xbf16>
    %cst_37 = arith.constant dense<0.000000e+00> : vector<8x32xf32>
    %83 = tpu.matmul %74, %82, %cst_37 {dimension_numbers = #tpu.dot_dimension_numbers<[1], [0], [0], [1], [0, 0, 1, 1], [], []>} : vector<8x32xbf16>, vector<32x32xbf16>, vector<8x32xf32> -> vector<8x32xf32>
    %c1_38 = arith.constant 1 : index
    %c0_39 = arith.constant 0 : index
    %84 = vector.load %arg9[%c1_38, %c0_39] : memref<4x32xf32, #tpu.memory_space<vmem>>, vector<1x32xf32>
    %85 = vector.broadcast %84 : vector<1x32xf32> to vector<8x32xf32>
    %86 = arith.addf %83, %85 : vector<8x32xf32>
    %c2 = arith.constant 2 : index
    %c0_40 = arith.constant 0 : index
    %c0_41 = arith.constant 0 : index
    %87 = vector.load %arg8[%c2, %c0_40, %c0_41] : memref<4x32x32xbf16, #tpu.memory_space<vmem>>, vector<1x32x32xbf16>
    %88 = vector.shape_cast %87 : vector<1x32x32xbf16> to vector<32x32xbf16>
    %cst_42 = arith.constant dense<0.000000e+00> : vector<8x32xf32>
    %89 = tpu.matmul %74, %88, %cst_42 {dimension_numbers = #tpu.dot_dimension_numbers<[1], [0], [0], [1], [0, 0, 1, 1], [], []>} : vector<8x32xbf16>, vector<32x32xbf16>, vector<8x32xf32> -> vector<8x32xf32>
    %c2_43 = arith.constant 2 : index
    %c0_44 = arith.constant 0 : index
    %90 = vector.load %arg9[%c2_43, %c0_44] : memref<4x32xf32, #tpu.memory_space<vmem>>, vector<1x32xf32>
    %91 = vector.broadcast %90 : vector<1x32xf32> to vector<8x32xf32>
    %92 = arith.addf %89, %91 : vector<8x32xf32>
    %cst_45 = arith.constant 0.353553385 : f32
    %93 = vector.broadcast %cst_45 : f32 to vector<8x32xf32>
    %94 = arith.mulf %80, %93 : vector<8x32xf32>
    %95 = arith.truncf %94 : vector<8x32xf32> to vector<8x32xbf16>
    %96 = arith.truncf %86 : vector<8x32xf32> to vector<8x32xbf16>
    %97 = arith.truncf %92 : vector<8x32xf32> to vector<8x32xbf16>
    %98 = vector.extract_strided_slice %95 {offsets = [0, 0], sizes = [8, 8], strides = [1, 1]} : vector<8x32xbf16> to vector<8x8xbf16>
    %99 = vector.extract_strided_slice %96 {offsets = [0, 0], sizes = [8, 8], strides = [1, 1]} : vector<8x32xbf16> to vector<8x8xbf16>
    %100 = vector.extract_strided_slice %97 {offsets = [0, 0], sizes = [8, 8], strides = [1, 1]} : vector<8x32xbf16> to vector<8x8xbf16>
    %cst_46 = arith.constant dense<0.000000e+00> : vector<8x8xf32>
    %101 = tpu.matmul %98, %99, %cst_46 {dimension_numbers = #tpu.dot_dimension_numbers<[1], [1], [0], [0], [0, 0, 1, 0], [], []>} : vector<8x8xbf16>, vector<8x8xbf16>, vector<8x8xf32> -> vector<8x8xf32>
    %102 = arith.addf %101, %14 : vector<8x8xf32>
    %cst_47 = arith.constant dense<0xFF800000> : vector<8xf32>
    %103 = vector.multi_reduction <maximumf>, %102, %cst_47 [1] : vector<8x8xf32> to vector<8xf32>
    %104 = vector.shape_cast %103 : vector<8xf32> to vector<8x1xf32>
    %105 = vector.broadcast %104 : vector<8x1xf32> to vector<8x8xf32>
    %106 = arith.subf %102, %105 : vector<8x8xf32>
    %107 = math.exp %106 : vector<8x8xf32>
    %cst_48 = arith.constant dense<0.000000e+00> : vector<8xf32>
    %108 = vector.multi_reduction <add>, %107, %cst_48 [1] : vector<8x8xf32> to vector<8xf32>
    %109 = vector.shape_cast %108 : vector<8xf32> to vector<8x1xf32>
    %110 = tpu.reciprocal %109 {approx = true} : vector<8x1xf32> -> vector<8x1xf32>
    %111 = vector.broadcast %110 : vector<8x1xf32> to vector<8x8xf32>
    %112 = arith.mulf %107, %111 : vector<8x8xf32>
    %113 = arith.truncf %112 : vector<8x8xf32> to vector<8x8xbf16>
    %cst_49 = arith.constant dense<0.000000e+00> : vector<8x8xf32>
    %114 = tpu.matmul %113, %100, %cst_49 {dimension_numbers = #tpu.dot_dimension_numbers<[1], [0], [0], [1], [0, 0, 1, 1], [], []>} : vector<8x8xbf16>, vector<8x8xbf16>, vector<8x8xf32> -> vector<8x8xf32>
    %c0_50 = arith.constant 0 : index
    %c0_51 = arith.constant 0 : index
    %115 = vector.load %arg17[%c0_50, %c0_51] : memref<8x32xf32, #tpu.memory_space<vmem>>, vector<8x8xf32>
    tpu.vector_store %arg17[%c0_50, %c0_51], %114 {strides = array<i32>} : memref<8x32xf32, #tpu.memory_space<vmem>>, vector<8x8xf32>,
    %116 = vector.extract_strided_slice %95 {offsets = [0, 8], sizes = [8, 8], strides = [1, 1]} : vector<8x32xbf16> to vector<8x8xbf16>
    %117 = vector.extract_strided_slice %96 {offsets = [0, 8], sizes = [8, 8], strides = [1, 1]} : vector<8x32xbf16> to vector<8x8xbf16>
    %118 = vector.extract_strided_slice %97 {offsets = [0, 8], sizes = [8, 8], strides = [1, 1]} : vector<8x32xbf16> to vector<8x8xbf16>
    %cst_52 = arith.constant dense<0.000000e+00> : vector<8x8xf32>
    %119 = tpu.matmul %116, %117, %cst_52 {dimension_numbers = #tpu.dot_dimension_numbers<[1], [1], [0], [0], [0, 0, 1, 0], [], []>} : vector<8x8xbf16>, vector<8x8xbf16>, vector<8x8xf32> -> vector<8x8xf32>
    %120 = arith.addf %119, %14 : vector<8x8xf32>
    %cst_53 = arith.constant dense<0xFF800000> : vector<8xf32>
    %121 = vector.multi_reduction <maximumf>, %120, %cst_53 [1] : vector<8x8xf32> to vector<8xf32>
    %122 = vector.shape_cast %121 : vector<8xf32> to vector<8x1xf32>
    %123 = vector.broadcast %122 : vector<8x1xf32> to vector<8x8xf32>
    %124 = arith.subf %120, %123 : vector<8x8xf32>
    %125 = math.exp %124 : vector<8x8xf32>
    %cst_54 = arith.constant dense<0.000000e+00> : vector<8xf32>
    %126 = vector.multi_reduction <add>, %125, %cst_54 [1] : vector<8x8xf32> to vector<8xf32>
    %127 = vector.shape_cast %126 : vector<8xf32> to vector<8x1xf32>
    %128 = tpu.reciprocal %127 {approx = true} : vector<8x1xf32> -> vector<8x1xf32>
    %129 = vector.broadcast %128 : vector<8x1xf32> to vector<8x8xf32>
    %130 = arith.mulf %125, %129 : vector<8x8xf32>
    %131 = arith.truncf %130 : vector<8x8xf32> to vector<8x8xbf16>
    %cst_55 = arith.constant dense<0.000000e+00> : vector<8x8xf32>
    %132 = tpu.matmul %131, %118, %cst_55 {dimension_numbers = #tpu.dot_dimension_numbers<[1], [0], [0], [1], [0, 0, 1, 1], [], []>} : vector<8x8xbf16>, vector<8x8xbf16>, vector<8x8xf32> -> vector<8x8xf32>
    %c0_56 = arith.constant 0 : index
    %c8 = arith.constant 8 : index
    %133 = vector.load %arg17[%c0_56, %c8] : memref<8x32xf32, #tpu.memory_space<vmem>>, vector<8x8xf32>
    tpu.vector_store %arg17[%c0_56, %c8], %132 {strides = array<i32>} : memref<8x32xf32, #tpu.memory_space<vmem>>, vector<8x8xf32>,
    %134 = vector.extract_strided_slice %95 {offsets = [0, 16], sizes = [8, 8], strides = [1, 1]} : vector<8x32xbf16> to vector<8x8xbf16>
    %135 = vector.extract_strided_slice %96 {offsets = [0, 16], sizes = [8, 8], strides = [1, 1]} : vector<8x32xbf16> to vector<8x8xbf16>
    %136 = vector.extract_strided_slice %97 {offsets = [0, 16], sizes = [8, 8], strides = [1, 1]} : vector<8x32xbf16> to vector<8x8xbf16>
    %cst_57 = arith.constant dense<0.000000e+00> : vector<8x8xf32>
    %137 = tpu.matmul %134, %135, %cst_57 {dimension_numbers = #tpu.dot_dimension_numbers<[1], [1], [0], [0], [0, 0, 1, 0], [], []>} : vector<8x8xbf16>, vector<8x8xbf16>, vector<8x8xf32> -> vector<8x8xf32>
    %138 = arith.addf %137, %14 : vector<8x8xf32>
    %cst_58 = arith.constant dense<0xFF800000> : vector<8xf32>
    %139 = vector.multi_reduction <maximumf>, %138, %cst_58 [1] : vector<8x8xf32> to vector<8xf32>
    %140 = vector.shape_cast %139 : vector<8xf32> to vector<8x1xf32>
    %141 = vector.broadcast %140 : vector<8x1xf32> to vector<8x8xf32>
    %142 = arith.subf %138, %141 : vector<8x8xf32>
    %143 = math.exp %142 : vector<8x8xf32>
    %cst_59 = arith.constant dense<0.000000e+00> : vector<8xf32>
    %144 = vector.multi_reduction <add>, %143, %cst_59 [1] : vector<8x8xf32> to vector<8xf32>
    %145 = vector.shape_cast %144 : vector<8xf32> to vector<8x1xf32>
    %146 = tpu.reciprocal %145 {approx = true} : vector<8x1xf32> -> vector<8x1xf32>
    %147 = vector.broadcast %146 : vector<8x1xf32> to vector<8x8xf32>
    %148 = arith.mulf %143, %147 : vector<8x8xf32>
    %149 = arith.truncf %148 : vector<8x8xf32> to vector<8x8xbf16>
    %cst_60 = arith.constant dense<0.000000e+00> : vector<8x8xf32>
    %150 = tpu.matmul %149, %136, %cst_60 {dimension_numbers = #tpu.dot_dimension_numbers<[1], [0], [0], [1], [0, 0, 1, 1], [], []>} : vector<8x8xbf16>, vector<8x8xbf16>, vector<8x8xf32> -> vector<8x8xf32>
    %c0_61 = arith.constant 0 : index
    %c16 = arith.constant 16 : index
    %151 = vector.load %arg17[%c0_61, %c16] : memref<8x32xf32, #tpu.memory_space<vmem>>, vector<8x8xf32>
    tpu.vector_store %arg17[%c0_61, %c16], %150 {strides = array<i32>} : memref<8x32xf32, #tpu.memory_space<vmem>>, vector<8x8xf32>,
    %152 = vector.extract_strided_slice %95 {offsets = [0, 24], sizes = [8, 8], strides = [1, 1]} : vector<8x32xbf16> to vector<8x8xbf16>
    %153 = vector.extract_strided_slice %96 {offsets = [0, 24], sizes = [8, 8], strides = [1, 1]} : vector<8x32xbf16> to vector<8x8xbf16>
    %154 = vector.extract_strided_slice %97 {offsets = [0, 24], sizes = [8, 8], strides = [1, 1]} : vector<8x32xbf16> to vector<8x8xbf16>
    %cst_62 = arith.constant dense<0.000000e+00> : vector<8x8xf32>
    %155 = tpu.matmul %152, %153, %cst_62 {dimension_numbers = #tpu.dot_dimension_numbers<[1], [1], [0], [0], [0, 0, 1, 0], [], []>} : vector<8x8xbf16>, vector<8x8xbf16>, vector<8x8xf32> -> vector<8x8xf32>
    %156 = arith.addf %155, %14 : vector<8x8xf32>
    %cst_63 = arith.constant dense<0xFF800000> : vector<8xf32>
    %157 = vector.multi_reduction <maximumf>, %156, %cst_63 [1] : vector<8x8xf32> to vector<8xf32>
    %158 = vector.shape_cast %157 : vector<8xf32> to vector<8x1xf32>
    %159 = vector.broadcast %158 : vector<8x1xf32> to vector<8x8xf32>
    %160 = arith.subf %156, %159 : vector<8x8xf32>
    %161 = math.exp %160 : vector<8x8xf32>
    %cst_64 = arith.constant dense<0.000000e+00> : vector<8xf32>
    %162 = vector.multi_reduction <add>, %161, %cst_64 [1] : vector<8x8xf32> to vector<8xf32>
    %163 = vector.shape_cast %162 : vector<8xf32> to vector<8x1xf32>
    %164 = tpu.reciprocal %163 {approx = true} : vector<8x1xf32> -> vector<8x1xf32>
    %165 = vector.broadcast %164 : vector<8x1xf32> to vector<8x8xf32>
    %166 = arith.mulf %161, %165 : vector<8x8xf32>
    %167 = arith.truncf %166 : vector<8x8xf32> to vector<8x8xbf16>
    %cst_65 = arith.constant dense<0.000000e+00> : vector<8x8xf32>
    %168 = tpu.matmul %167, %154, %cst_65 {dimension_numbers = #tpu.dot_dimension_numbers<[1], [0], [0], [1], [0, 0, 1, 1], [], []>} : vector<8x8xbf16>, vector<8x8xbf16>, vector<8x8xf32> -> vector<8x8xf32>
    %c0_66 = arith.constant 0 : index
    %c24 = arith.constant 24 : index
    %169 = vector.load %arg17[%c0_66, %c24] : memref<8x32xf32, #tpu.memory_space<vmem>>, vector<8x8xf32>
    tpu.vector_store %arg17[%c0_66, %c24], %168 {strides = array<i32>} : memref<8x32xf32, #tpu.memory_space<vmem>>, vector<8x8xf32>,
    %c0_67 = arith.constant 0 : index
    %c0_68 = arith.constant 0 : index
    %170 = vector.load %arg17[%c0_67, %c0_68] : memref<8x32xf32, #tpu.memory_space<vmem>>, vector<8x32xf32>
    %171 = arith.truncf %170 : vector<8x32xf32> to vector<8x32xbf16>
    %c3 = arith.constant 3 : index
    %c0_69 = arith.constant 0 : index
    %c0_70 = arith.constant 0 : index
    %172 = vector.load %arg8[%c3, %c0_69, %c0_70] : memref<4x32x32xbf16, #tpu.memory_space<vmem>>, vector<1x32x32xbf16>
    %173 = vector.shape_cast %172 : vector<1x32x32xbf16> to vector<32x32xbf16>
    %cst_71 = arith.constant dense<0.000000e+00> : vector<8x32xf32>
    %174 = tpu.matmul %171, %173, %cst_71 {dimension_numbers = #tpu.dot_dimension_numbers<[1], [0], [0], [1], [0, 0, 1, 1], [], []>} : vector<8x32xbf16>, vector<32x32xbf16>, vector<8x32xf32> -> vector<8x32xf32>
    %c3_72 = arith.constant 3 : index
    %c0_73 = arith.constant 0 : index
    %175 = vector.load %arg9[%c3_72, %c0_73] : memref<4x32xf32, #tpu.memory_space<vmem>>, vector<1x32xf32>
    %176 = vector.broadcast %175 : vector<1x32xf32> to vector<8x32xf32>
    %177 = arith.addf %174, %176 : vector<8x32xf32>
    %178 = arith.addf %1, %177 : vector<8x32xf32>
    %c1_74 = arith.constant 1 : index
    %c0_75 = arith.constant 0 : index
    %179 = vector.load %arg6[%c1_74, %c0_75] : memref<3x32xf32, #tpu.memory_space<vmem>>, vector<1x32xf32>
    %c1_76 = arith.constant 1 : index
    %c0_77 = arith.constant 0 : index
    %180 = vector.load %arg7[%c1_76, %c0_77] : memref<3x32xf32, #tpu.memory_space<vmem>>, vector<1x32xf32>
    %cst_78 = arith.constant dense<0.000000e+00> : vector<8xf32>
    %181 = vector.multi_reduction <add>, %178, %cst_78 [1] : vector<8x32xf32> to vector<8xf32>
    %182 = vector.shape_cast %181 : vector<8xf32> to vector<8x1xf32>
    %cst_79 = arith.constant 3.200000e+01 : f32
    %183 = vector.broadcast %cst_79 : f32 to vector<8x1xf32>
    %184 = arith.divf %182, %183 : vector<8x1xf32>
    %185 = vector.broadcast %184 : vector<8x1xf32> to vector<8x32xf32>
    %186 = arith.subf %178, %185 : vector<8x32xf32>
    %187 = arith.mulf %186, %186 : vector<8x32xf32>
    %cst_80 = arith.constant dense<0.000000e+00> : vector<8xf32>
    %188 = vector.multi_reduction <add>, %187, %cst_80 [1] : vector<8x32xf32> to vector<8xf32>
    %189 = vector.shape_cast %188 : vector<8xf32> to vector<8x1xf32>
    %cst_81 = arith.constant 0.0322580636 : f32
    %190 = vector.broadcast %cst_81 : f32 to vector<8x1xf32>
    %191 = arith.mulf %189, %190 : vector<8x1xf32>
    %192 = math.sqrt %191 : vector<8x1xf32>
    %cst_82 = arith.constant 9.99999997E-7 : f32
    %193 = vector.broadcast %cst_82 : f32 to vector<8x1xf32>
    %194 = arith.addf %192, %193 : vector<8x1xf32>
    %195 = tpu.reciprocal %194 {approx = true} : vector<8x1xf32> -> vector<8x1xf32>
    %196 = vector.broadcast %184 : vector<8x1xf32> to vector<8x32xf32>
    %197 = arith.subf %178, %196 : vector<8x32xf32>
    %198 = vector.broadcast %179 : vector<1x32xf32> to vector<8x32xf32>
    %199 = arith.mulf %198, %197 : vector<8x32xf32>
    %200 = vector.broadcast %195 : vector<8x1xf32> to vector<8x32xf32>
    %201 = arith.mulf %199, %200 : vector<8x32xf32>
    %202 = vector.broadcast %180 : vector<1x32xf32> to vector<8x32xf32>
    %203 = arith.addf %201, %202 : vector<8x32xf32>
    %204 = arith.truncf %203 : vector<8x32xf32> to vector<8x32xbf16>
    %c0_83 = arith.constant 0 : index
    %c0_84 = arith.constant 0 : index
    %c0_85 = arith.constant 0 : index
    %205 = vector.load %arg10[%c0_83, %c0_84, %c0_85] : memref<4x32x32xbf16, #tpu.memory_space<vmem>>, vector<1x32x32xbf16>
    %206 = vector.shape_cast %205 : vector<1x32x32xbf16> to vector<32x32xbf16>
    %cst_86 = arith.constant dense<0.000000e+00> : vector<8x32xf32>
    %207 = tpu.matmul %204, %206, %cst_86 {dimension_numbers = #tpu.dot_dimension_numbers<[1], [0], [0], [1], [0, 0, 1, 1], [], []>} : vector<8x32xbf16>, vector<32x32xbf16>, vector<8x32xf32> -> vector<8x32xf32>
    %c0_87 = arith.constant 0 : index
    %c0_88 = arith.constant 0 : index
    %208 = vector.load %arg11[%c0_87, %c0_88] : memref<4x32xf32, #tpu.memory_space<vmem>>, vector<1x32xf32>
    %209 = vector.broadcast %208 : vector<1x32xf32> to vector<8x32xf32>
    %210 = arith.addf %207, %209 : vector<8x32xf32>
    %c1_89 = arith.constant 1 : index
    %c0_90 = arith.constant 0 : index
    %c0_91 = arith.constant 0 : index
    %211 = vector.load %arg10[%c1_89, %c0_90, %c0_91] : memref<4x32x32xbf16, #tpu.memory_space<vmem>>, vector<1x32x32xbf16>
    %212 = vector.shape_cast %211 : vector<1x32x32xbf16> to vector<32x32xbf16>
    %cst_92 = arith.constant dense<0.000000e+00> : vector<16x32xf32>
    %213 = tpu.matmul %5, %212, %cst_92 {dimension_numbers = #tpu.dot_dimension_numbers<[1], [0], [0], [1], [0, 0, 1, 1], [], []>} : vector<16x32xbf16>, vector<32x32xbf16>, vector<16x32xf32> -> vector<16x32xf32>
    %c1_93 = arith.constant 1 : index
    %c0_94 = arith.constant 0 : index
    %214 = vector.load %arg11[%c1_93, %c0_94] : memref<4x32xf32, #tpu.memory_space<vmem>>, vector<1x32xf32>
    %215 = vector.broadcast %214 : vector<1x32xf32> to vector<16x32xf32>
    %216 = arith.addf %213, %215 : vector<16x32xf32>
    %c2_95 = arith.constant 2 : index
    %c0_96 = arith.constant 0 : index
    %c0_97 = arith.constant 0 : index
    %217 = vector.load %arg10[%c2_95, %c0_96, %c0_97] : memref<4x32x32xbf16, #tpu.memory_space<vmem>>, vector<1x32x32xbf16>
    %218 = vector.shape_cast %217 : vector<1x32x32xbf16> to vector<32x32xbf16>
    %cst_98 = arith.constant dense<0.000000e+00> : vector<16x32xf32>
    %219 = tpu.matmul %5, %218, %cst_98 {dimension_numbers = #tpu.dot_dimension_numbers<[1], [0], [0], [1], [0, 0, 1, 1], [], []>} : vector<16x32xbf16>, vector<32x32xbf16>, vector<16x32xf32> -> vector<16x32xf32>
    %c2_99 = arith.constant 2 : index
    %c0_100 = arith.constant 0 : index
    %220 = vector.load %arg11[%c2_99, %c0_100] : memref<4x32xf32, #tpu.memory_space<vmem>>, vector<1x32xf32>
    %221 = vector.broadcast %220 : vector<1x32xf32> to vector<16x32xf32>
    %222 = arith.addf %219, %221 : vector<16x32xf32>
    %cst_101 = arith.constant 0.353553385 : f32
    %223 = vector.broadcast %cst_101 : f32 to vector<8x32xf32>
    %224 = arith.mulf %210, %223 : vector<8x32xf32>
    %225 = arith.truncf %224 : vector<8x32xf32> to vector<8x32xbf16>
    %226 = arith.truncf %216 : vector<16x32xf32> to vector<16x32xbf16>
    %227 = arith.truncf %222 : vector<16x32xf32> to vector<16x32xbf16>
    %228 = vector.extract_strided_slice %225 {offsets = [0, 0], sizes = [8, 8], strides = [1, 1]} : vector<8x32xbf16> to vector<8x8xbf16>
    %229 = vector.extract_strided_slice %226 {offsets = [0, 0], sizes = [16, 8], strides = [1, 1]} : vector<16x32xbf16> to vector<16x8xbf16>
    %230 = vector.extract_strided_slice %227 {offsets = [0, 0], sizes = [16, 8], strides = [1, 1]} : vector<16x32xbf16> to vector<16x8xbf16>
    %cst_102 = arith.constant dense<0.000000e+00> : vector<8x16xf32>
    %231 = tpu.matmul %228, %229, %cst_102 {dimension_numbers = #tpu.dot_dimension_numbers<[1], [1], [0], [0], [0, 0, 1, 0], [], []>} : vector<8x8xbf16>, vector<16x8xbf16>, vector<8x16xf32> -> vector<8x16xf32>
    %232 = arith.addf %231, %22 : vector<8x16xf32>
    %cst_103 = arith.constant dense<0xFF800000> : vector<8xf32>
    %233 = vector.multi_reduction <maximumf>, %232, %cst_103 [1] : vector<8x16xf32> to vector<8xf32>
    %234 = vector.shape_cast %233 : vector<8xf32> to vector<8x1xf32>
    %235 = vector.broadcast %234 : vector<8x1xf32> to vector<8x16xf32>
    %236 = arith.subf %232, %235 : vector<8x16xf32>
    %237 = math.exp %236 : vector<8x16xf32>
    %cst_104 = arith.constant dense<0.000000e+00> : vector<8xf32>
    %238 = vector.multi_reduction <add>, %237, %cst_104 [1] : vector<8x16xf32> to vector<8xf32>
    %239 = vector.shape_cast %238 : vector<8xf32> to vector<8x1xf32>
    %240 = tpu.reciprocal %239 {approx = true} : vector<8x1xf32> -> vector<8x1xf32>
    %241 = vector.broadcast %240 : vector<8x1xf32> to vector<8x16xf32>
    %242 = arith.mulf %237, %241 : vector<8x16xf32>
    %243 = arith.truncf %242 : vector<8x16xf32> to vector<8x16xbf16>
    %cst_105 = arith.constant dense<0.000000e+00> : vector<8x8xf32>
    %244 = tpu.matmul %243, %230, %cst_105 {dimension_numbers = #tpu.dot_dimension_numbers<[1], [0], [0], [1], [0, 0, 1, 1], [], []>} : vector<8x16xbf16>, vector<16x8xbf16>, vector<8x8xf32> -> vector<8x8xf32>
    %c0_106 = arith.constant 0 : index
    %c0_107 = arith.constant 0 : index
    %245 = vector.load %arg17[%c0_106, %c0_107] : memref<8x32xf32, #tpu.memory_space<vmem>>, vector<8x8xf32>
    tpu.vector_store %arg17[%c0_106, %c0_107], %244 {strides = array<i32>} : memref<8x32xf32, #tpu.memory_space<vmem>>, vector<8x8xf32>,
    %246 = vector.extract_strided_slice %225 {offsets = [0, 8], sizes = [8, 8], strides = [1, 1]} : vector<8x32xbf16> to vector<8x8xbf16>
    %247 = vector.extract_strided_slice %226 {offsets = [0, 8], sizes = [16, 8], strides = [1, 1]} : vector<16x32xbf16> to vector<16x8xbf16>
    %248 = vector.extract_strided_slice %227 {offsets = [0, 8], sizes = [16, 8], strides = [1, 1]} : vector<16x32xbf16> to vector<16x8xbf16>
    %cst_108 = arith.constant dense<0.000000e+00> : vector<8x16xf32>
    %249 = tpu.matmul %246, %247, %cst_108 {dimension_numbers = #tpu.dot_dimension_numbers<[1], [1], [0], [0], [0, 0, 1, 0], [], []>} : vector<8x8xbf16>, vector<16x8xbf16>, vector<8x16xf32> -> vector<8x16xf32>
    %250 = arith.addf %249, %22 : vector<8x16xf32>
    %cst_109 = arith.constant dense<0xFF800000> : vector<8xf32>
    %251 = vector.multi_reduction <maximumf>, %250, %cst_109 [1] : vector<8x16xf32> to vector<8xf32>
    %252 = vector.shape_cast %251 : vector<8xf32> to vector<8x1xf32>
    %253 = vector.broadcast %252 : vector<8x1xf32> to vector<8x16xf32>
    %254 = arith.subf %250, %253 : vector<8x16xf32>
    %255 = math.exp %254 : vector<8x16xf32>
    %cst_110 = arith.constant dense<0.000000e+00> : vector<8xf32>
    %256 = vector.multi_reduction <add>, %255, %cst_110 [1] : vector<8x16xf32> to vector<8xf32>
    %257 = vector.shape_cast %256 : vector<8xf32> to vector<8x1xf32>
    %258 = tpu.reciprocal %257 {approx = true} : vector<8x1xf32> -> vector<8x1xf32>
    %259 = vector.broadcast %258 : vector<8x1xf32> to vector<8x16xf32>
    %260 = arith.mulf %255, %259 : vector<8x16xf32>
    %261 = arith.truncf %260 : vector<8x16xf32> to vector<8x16xbf16>
    %cst_111 = arith.constant dense<0.000000e+00> : vector<8x8xf32>
    %262 = tpu.matmul %261, %248, %cst_111 {dimension_numbers = #tpu.dot_dimension_numbers<[1], [0], [0], [1], [0, 0, 1, 1], [], []>} : vector<8x16xbf16>, vector<16x8xbf16>, vector<8x8xf32> -> vector<8x8xf32>
    %c0_112 = arith.constant 0 : index
    %c8_113 = arith.constant 8 : index
    %263 = vector.load %arg17[%c0_112, %c8_113] : memref<8x32xf32, #tpu.memory_space<vmem>>, vector<8x8xf32>
    tpu.vector_store %arg17[%c0_112, %c8_113], %262 {strides = array<i32>} : memref<8x32xf32, #tpu.memory_space<vmem>>, vector<8x8xf32>,
    %264 = vector.extract_strided_slice %225 {offsets = [0, 16], sizes = [8, 8], strides = [1, 1]} : vector<8x32xbf16> to vector<8x8xbf16>
    %265 = vector.extract_strided_slice %226 {offsets = [0, 16], sizes = [16, 8], strides = [1, 1]} : vector<16x32xbf16> to vector<16x8xbf16>
    %266 = vector.extract_strided_slice %227 {offsets = [0, 16], sizes = [16, 8], strides = [1, 1]} : vector<16x32xbf16> to vector<16x8xbf16>
    %cst_114 = arith.constant dense<0.000000e+00> : vector<8x16xf32>
    %267 = tpu.matmul %264, %265, %cst_114 {dimension_numbers = #tpu.dot_dimension_numbers<[1], [1], [0], [0], [0, 0, 1, 0], [], []>} : vector<8x8xbf16>, vector<16x8xbf16>, vector<8x16xf32> -> vector<8x16xf32>
    %268 = arith.addf %267, %22 : vector<8x16xf32>
    %cst_115 = arith.constant dense<0xFF800000> : vector<8xf32>
    %269 = vector.multi_reduction <maximumf>, %268, %cst_115 [1] : vector<8x16xf32> to vector<8xf32>
    %270 = vector.shape_cast %269 : vector<8xf32> to vector<8x1xf32>
    %271 = vector.broadcast %270 : vector<8x1xf32> to vector<8x16xf32>
    %272 = arith.subf %268, %271 : vector<8x16xf32>
    %273 = math.exp %272 : vector<8x16xf32>
    %cst_116 = arith.constant dense<0.000000e+00> : vector<8xf32>
    %274 = vector.multi_reduction <add>, %273, %cst_116 [1] : vector<8x16xf32> to vector<8xf32>
    %275 = vector.shape_cast %274 : vector<8xf32> to vector<8x1xf32>
    %276 = tpu.reciprocal %275 {approx = true} : vector<8x1xf32> -> vector<8x1xf32>
    %277 = vector.broadcast %276 : vector<8x1xf32> to vector<8x16xf32>
    %278 = arith.mulf %273, %277 : vector<8x16xf32>
    %279 = arith.truncf %278 : vector<8x16xf32> to vector<8x16xbf16>
    %cst_117 = arith.constant dense<0.000000e+00> : vector<8x8xf32>
    %280 = tpu.matmul %279, %266, %cst_117 {dimension_numbers = #tpu.dot_dimension_numbers<[1], [0], [0], [1], [0, 0, 1, 1], [], []>} : vector<8x16xbf16>, vector<16x8xbf16>, vector<8x8xf32> -> vector<8x8xf32>
    %c0_118 = arith.constant 0 : index
    %c16_119 = arith.constant 16 : index
    %281 = vector.load %arg17[%c0_118, %c16_119] : memref<8x32xf32, #tpu.memory_space<vmem>>, vector<8x8xf32>
    tpu.vector_store %arg17[%c0_118, %c16_119], %280 {strides = array<i32>} : memref<8x32xf32, #tpu.memory_space<vmem>>, vector<8x8xf32>,
    %282 = vector.extract_strided_slice %225 {offsets = [0, 24], sizes = [8, 8], strides = [1, 1]} : vector<8x32xbf16> to vector<8x8xbf16>
    %283 = vector.extract_strided_slice %226 {offsets = [0, 24], sizes = [16, 8], strides = [1, 1]} : vector<16x32xbf16> to vector<16x8xbf16>
    %284 = vector.extract_strided_slice %227 {offsets = [0, 24], sizes = [16, 8], strides = [1, 1]} : vector<16x32xbf16> to vector<16x8xbf16>
    %cst_120 = arith.constant dense<0.000000e+00> : vector<8x16xf32>
    %285 = tpu.matmul %282, %283, %cst_120 {dimension_numbers = #tpu.dot_dimension_numbers<[1], [1], [0], [0], [0, 0, 1, 0], [], []>} : vector<8x8xbf16>, vector<16x8xbf16>, vector<8x16xf32> -> vector<8x16xf32>
    %286 = arith.addf %285, %22 : vector<8x16xf32>
    %cst_121 = arith.constant dense<0xFF800000> : vector<8xf32>
    %287 = vector.multi_reduction <maximumf>, %286, %cst_121 [1] : vector<8x16xf32> to vector<8xf32>
    %288 = vector.shape_cast %287 : vector<8xf32> to vector<8x1xf32>
    %289 = vector.broadcast %288 : vector<8x1xf32> to vector<8x16xf32>
    %290 = arith.subf %286, %289 : vector<8x16xf32>
    %291 = math.exp %290 : vector<8x16xf32>
    %cst_122 = arith.constant dense<0.000000e+00> : vector<8xf32>
    %292 = vector.multi_reduction <add>, %291, %cst_122 [1] : vector<8x16xf32> to vector<8xf32>
    %293 = vector.shape_cast %292 : vector<8xf32> to vector<8x1xf32>
    %294 = tpu.reciprocal %293 {approx = true} : vector<8x1xf32> -> vector<8x1xf32>
    %295 = vector.broadcast %294 : vector<8x1xf32> to vector<8x16xf32>
    %296 = arith.mulf %291, %295 : vector<8x16xf32>
    %297 = arith.truncf %296 : vector<8x16xf32> to vector<8x16xbf16>
    %cst_123 = arith.constant dense<0.000000e+00> : vector<8x8xf32>
    %298 = tpu.matmul %297, %284, %cst_123 {dimension_numbers = #tpu.dot_dimension_numbers<[1], [0], [0], [1], [0, 0, 1, 1], [], []>} : vector<8x16xbf16>, vector<16x8xbf16>, vector<8x8xf32> -> vector<8x8xf32>
    %c0_124 = arith.constant 0 : index
    %c24_125 = arith.constant 24 : index
    %299 = vector.load %arg17[%c0_124, %c24_125] : memref<8x32xf32, #tpu.memory_space<vmem>>, vector<8x8xf32>
    tpu.vector_store %arg17[%c0_124, %c24_125], %298 {strides = array<i32>} : memref<8x32xf32, #tpu.memory_space<vmem>>, vector<8x8xf32>,
    %c0_126 = arith.constant 0 : index
    %c0_127 = arith.constant 0 : index
    %300 = vector.load %arg17[%c0_126, %c0_127] : memref<8x32xf32, #tpu.memory_space<vmem>>, vector<8x32xf32>
    %301 = arith.truncf %300 : vector<8x32xf32> to vector<8x32xbf16>
    %c3_128 = arith.constant 3 : index
    %c0_129 = arith.constant 0 : index
    %c0_130 = arith.constant 0 : index
    %302 = vector.load %arg10[%c3_128, %c0_129, %c0_130] : memref<4x32x32xbf16, #tpu.memory_space<vmem>>, vector<1x32x32xbf16>
    %303 = vector.shape_cast %302 : vector<1x32x32xbf16> to vector<32x32xbf16>
    %cst_131 = arith.constant dense<0.000000e+00> : vector<8x32xf32>
    %304 = tpu.matmul %301, %303, %cst_131 {dimension_numbers = #tpu.dot_dimension_numbers<[1], [0], [0], [1], [0, 0, 1, 1], [], []>} : vector<8x32xbf16>, vector<32x32xbf16>, vector<8x32xf32> -> vector<8x32xf32>
    %c3_132 = arith.constant 3 : index
    %c0_133 = arith.constant 0 : index
    %305 = vector.load %arg11[%c3_132, %c0_133] : memref<4x32xf32, #tpu.memory_space<vmem>>, vector<1x32xf32>
    %306 = vector.broadcast %305 : vector<1x32xf32> to vector<8x32xf32>
    %307 = arith.addf %304, %306 : vector<8x32xf32>
    %308 = arith.addf %178, %307 : vector<8x32xf32>
    %c2_134 = arith.constant 2 : index
    %c0_135 = arith.constant 0 : index
    %309 = vector.load %arg6[%c2_134, %c0_135] : memref<3x32xf32, #tpu.memory_space<vmem>>, vector<1x32xf32>
    %c2_136 = arith.constant 2 : index
    %c0_137 = arith.constant 0 : index
    %310 = vector.load %arg7[%c2_136, %c0_137] : memref<3x32xf32, #tpu.memory_space<vmem>>, vector<1x32xf32>
    %cst_138 = arith.constant dense<0.000000e+00> : vector<8xf32>
    %311 = vector.multi_reduction <add>, %308, %cst_138 [1] : vector<8x32xf32> to vector<8xf32>
    %312 = vector.shape_cast %311 : vector<8xf32> to vector<8x1xf32>
    %cst_139 = arith.constant 3.200000e+01 : f32
    %313 = vector.broadcast %cst_139 : f32 to vector<8x1xf32>
    %314 = arith.divf %312, %313 : vector<8x1xf32>
    %315 = vector.broadcast %314 : vector<8x1xf32> to vector<8x32xf32>
    %316 = arith.subf %308, %315 : vector<8x32xf32>
    %317 = arith.mulf %316, %316 : vector<8x32xf32>
    %cst_140 = arith.constant dense<0.000000e+00> : vector<8xf32>
    %318 = vector.multi_reduction <add>, %317, %cst_140 [1] : vector<8x32xf32> to vector<8xf32>
    %319 = vector.shape_cast %318 : vector<8xf32> to vector<8x1xf32>
    %cst_141 = arith.constant 0.0322580636 : f32
    %320 = vector.broadcast %cst_141 : f32 to vector<8x1xf32>
    %321 = arith.mulf %319, %320 : vector<8x1xf32>
    %322 = math.sqrt %321 : vector<8x1xf32>
    %cst_142 = arith.constant 9.99999997E-7 : f32
    %323 = vector.broadcast %cst_142 : f32 to vector<8x1xf32>
    %324 = arith.addf %322, %323 : vector<8x1xf32>
    %325 = tpu.reciprocal %324 {approx = true} : vector<8x1xf32> -> vector<8x1xf32>
    %326 = vector.broadcast %314 : vector<8x1xf32> to vector<8x32xf32>
    %327 = arith.subf %308, %326 : vector<8x32xf32>
    %328 = vector.broadcast %309 : vector<1x32xf32> to vector<8x32xf32>
    %329 = arith.mulf %328, %327 : vector<8x32xf32>
    %330 = vector.broadcast %325 : vector<8x1xf32> to vector<8x32xf32>
    %331 = arith.mulf %329, %330 : vector<8x32xf32>
    %332 = vector.broadcast %310 : vector<1x32xf32> to vector<8x32xf32>
    %333 = arith.addf %331, %332 : vector<8x32xf32>
    %334 = arith.truncf %333 : vector<8x32xf32> to vector<8x32xbf16>
    %c0_143 = arith.constant 0 : index
    %c0_144 = arith.constant 0 : index
    %335 = vector.load %arg12[%c0_143, %c0_144] : memref<32x64xbf16, #tpu.memory_space<vmem>>, vector<32x64xbf16>
    %cst_145 = arith.constant dense<0.000000e+00> : vector<8x64xf32>
    %336 = tpu.matmul %334, %335, %cst_145 {dimension_numbers = #tpu.dot_dimension_numbers<[1], [0], [0], [1], [0, 0, 1, 1], [], []>} : vector<8x32xbf16>, vector<32x64xbf16>, vector<8x64xf32> -> vector<8x64xf32>
    %c0_146 = arith.constant 0 : index
    %c0_147 = arith.constant 0 : index
    %337 = vector.load %arg13[%c0_146, %c0_147] : memref<1x64xf32, #tpu.memory_space<vmem>>, vector<1x64xf32>
    %338 = vector.broadcast %337 : vector<1x64xf32> to vector<8x64xf32>
    %339 = arith.addf %336, %338 : vector<8x64xf32>
    %cst_148 = arith.constant 0.000000e+00 : f32
    %340 = vector.broadcast %cst_148 : f32 to vector<8x64xf32>
    %341 = arith.maximumf %339, %340 : vector<8x64xf32>
    %342 = arith.truncf %341 : vector<8x64xf32> to vector<8x64xbf16>
    %c0_149 = arith.constant 0 : index
    %c0_150 = arith.constant 0 : index
    %343 = vector.load %arg14[%c0_149, %c0_150] : memref<64x32xbf16, #tpu.memory_space<vmem>>, vector<64x32xbf16>
    %cst_151 = arith.constant dense<0.000000e+00> : vector<8x32xf32>
    %344 = tpu.matmul %342, %343, %cst_151 {dimension_numbers = #tpu.dot_dimension_numbers<[1], [0], [0], [1], [0, 0, 1, 1], [], []>} : vector<8x64xbf16>, vector<64x32xbf16>, vector<8x32xf32> -> vector<8x32xf32>
    %c0_152 = arith.constant 0 : index
    %c0_153 = arith.constant 0 : index
    %345 = vector.load %arg15[%c0_152, %c0_153] : memref<1x32xf32, #tpu.memory_space<vmem>>, vector<1x32xf32>
    %346 = vector.broadcast %345 : vector<1x32xf32> to vector<8x32xf32>
    %347 = arith.addf %344, %346 : vector<8x32xf32>
    %348 = arith.addf %308, %347 : vector<8x32xf32>
    %c0_154 = arith.constant 0 : index
    %c0_155 = arith.constant 0 : index
    %c0_156 = arith.constant 0 : index
    %349 = vector.load %arg16[%c0_154, %c0_155, %c0_156] : memref<1x8x32xf32, #tpu.memory_space<vmem>>, vector<1x8x32xf32>
    %350 = vector.shape_cast %349 : vector<1x8x32xf32> to vector<8x32xf32>
    %351 = vector.shape_cast %348 : vector<8x32xf32> to vector<1x8x32xf32>
    tpu.vector_store %arg16[%c0_154, %c0_155, %c0_156], %351 {strides = array<i32>} : memref<1x8x32xf32, #tpu.memory_space<vmem>>, vector<1x8x32xf32>,
    return
  }
  func.func @transform_0(%arg0: i32, %arg1: i32, %arg2: memref<2xi32, #tpu.memory_space<smem>>) -> (i32, i32, i32) {
    %c0_i32 = arith.constant 0 : i32
    %c0_i32_0 = arith.constant 0 : i32
    return %arg0, %arg1, %c0_i32 : i32, i32, i32
  }
  func.func @transform_1(%arg0: i32, %arg1: i32, %arg2: memref<2xi32, #tpu.memory_space<smem>>) -> (i32, i32, i32) {
    %c0_i32 = arith.constant 0 : i32
    %c0_i32_0 = arith.constant 0 : i32
    %c0_i32_1 = arith.constant 0 : i32
    return %arg0, %c0_i32, %c0_i32_0 : i32, i32, i32
  }
  func.func @transform_2(%arg0: i32, %arg1: i32, %arg2: memref<2xi32, #tpu.memory_space<smem>>) -> (i32, i32, i32) {
    %c0_i32 = arith.constant 0 : i32
    %c0_i32_0 = arith.constant 0 : i32
    %c0_i32_1 = arith.constant 0 : i32
    return %arg0, %c0_i32, %c0_i32_0 : i32, i32, i32
  }
  func.func @transform_3(%arg0: i32, %arg1: i32, %arg2: memref<2xi32, #tpu.memory_space<smem>>) -> (i32, i32) {
    %c0_i32 = arith.constant 0 : i32
    %c0_i32_0 = arith.constant 0 : i32
    %c0_i32_1 = arith.constant 0 : i32
    return %c0_i32, %c0_i32_0 : i32, i32
  }
  func.func @transform_4(%arg0: i32, %arg1: i32, %arg2: memref<2xi32, #tpu.memory_space<smem>>) -> (i32, i32) {
    %c0_i32 = arith.constant 0 : i32
    %c0_i32_0 = arith.constant 0 : i32
    %c0_i32_1 = arith.constant 0 : i32
    return %c0_i32, %c0_i32_0 : i32, i32
  }
  func.func @transform_5(%arg0: i32, %arg1: i32, %arg2: memref<2xi32, #tpu.memory_space<smem>>) -> (i32, i32, i32) {
    %c0_i32 = arith.constant 0 : i32
    %c0_i32_0 = arith.constant 0 : i32
    %c0_i32_1 = arith.constant 0 : i32
    %c0_i32_2 = arith.constant 0 : i32
    return %c0_i32, %c0_i32_0, %c0_i32_1 : i32, i32, i32
  }
  func.func @transform_6(%arg0: i32, %arg1: i32, %arg2: memref<2xi32, #tpu.memory_space<smem>>) -> (i32, i32) {
    %c0_i32 = arith.constant 0 : i32
    %c0_i32_0 = arith.constant 0 : i32
    %c0_i32_1 = arith.constant 0 : i32
    return %c0_i32, %c0_i32_0 : i32, i32
  }
  func.func @transform_7(%arg0: i32, %arg1: i32, %arg2: memref<2xi32, #tpu.memory_space<smem>>) -> (i32, i32, i32) {
    %c0_i32 = arith.constant 0 : i32
    %c0_i32_0 = arith.constant 0 : i32
    %c0_i32_1 = arith.constant 0 : i32
    %c0_i32_2 = arith.constant 0 : i32
    return %c0_i32, %c0_i32_0, %c0_i32_1 : i32, i32, i32
  }
  func.func @transform_8(%arg0: i32, %arg1: i32, %arg2: memref<2xi32, #tpu.memory_space<smem>>) -> (i32, i32) {
    %c0_i32 = arith.constant 0 : i32
    %c0_i32_0 = arith.constant 0 : i32
    %c0_i32_1 = arith.constant 0 : i32
    return %c0_i32, %c0_i32_0 : i32, i32
  }
  func.func @transform_9(%arg0: i32, %arg1: i32, %arg2: memref<2xi32, #tpu.memory_space<smem>>) -> (i32, i32) {
    %c0_i32 = arith.constant 0 : i32
    %c0_i32_0 = arith.constant 0 : i32
    %c0_i32_1 = arith.constant 0 : i32
    return %c0_i32, %c0_i32_0 : i32, i32
  }
  func.func @transform_10(%arg0: i32, %arg1: i32, %arg2: memref<2xi32, #tpu.memory_space<smem>>) -> (i32, i32) {
    %c0_i32 = arith.constant 0 : i32
    %c0_i32_0 = arith.constant 0 : i32
    %c0_i32_1 = arith.constant 0 : i32
    return %c0_i32, %c0_i32_0 : i32, i32
  }
  func.func @transform_11(%arg0: i32, %arg1: i32, %arg2: memref<2xi32, #tpu.memory_space<smem>>) -> (i32, i32) {
    %c0_i32 = arith.constant 0 : i32
    %c0_i32_0 = arith.constant 0 : i32
    %c0_i32_1 = arith.constant 0 : i32
    return %c0_i32, %c0_i32_0 : i32, i32
  }
  func.func @transform_12(%arg0: i32, %arg1: i32, %arg2: memref<2xi32, #tpu.memory_space<smem>>) -> (i32, i32) {
    %c0_i32 = arith.constant 0 : i32
    %c0_i32_0 = arith.constant 0 : i32
    %c0_i32_1 = arith.constant 0 : i32
    return %c0_i32, %c0_i32_0 : i32, i32
  }
  func.func @transform_13(%arg0: i32, %arg1: i32, %arg2: memref<2xi32, #tpu.memory_space<smem>>) -> (i32, i32, i32) {
    %c0_i32 = arith.constant 0 : i32
    %c0_i32_0 = arith.constant 0 : i32
    return %arg0, %arg1, %c0_i32 : i32, i32, i32
  }
}

</mosaic_0001>

<bundles_post_ra>
// kernel: tpu_custom_call.1
= control target key start
LH: loop header
LB: loop body
LE: loop exit
PB: predicated region body
PF: predicated region fallthrough
CT: control target
= control target key end

     0   :  { %s4283_s0 = inlined_call_operand.vmem [shape: s32[2], index: 0, kind: input, shape index: {}]   ;;  %s4284_s1 = inlined_call_operand.hbm [shape: f32[2,8,32], index: 1, kind: input, shape index: {}]   ;;  %s4285_s2 = inlined_call_operand.hbm [shape: f32[2,8,32], index: 2, kind: input, shape index: {}]   ;;  %s4286_s3 = inlined_call_operand.hbm [shape: bf16[2,16,32], index: 3, kind: input, shape index: {}]   ;;  %s4287_s4 = inlined_call_operand.hbm [shape: f32[3,32], index: 4, kind: input, shape index: {}]   ;;  %s4288_s5 = inlined_call_operand.hbm [shape: f32[3,32], index: 5, kind: input, shape index: {}]   ;;  %s4289_s6 = inlined_call_operand.vmem [shape: bf16[4,32,32], index: 6, kind: input, shape index: {}]   ;;  %s4290_s7 = inlined_call_operand.hbm [shape: f32[4,32], index: 7, kind: input, shape index: {}]   ;;  %s4291_s8 = inlined_call_operand.hbm [shape: bf16[4,32,32], index: 8, kind: input, shape index: {}]   ;;  %s4292_s9 = inlined_call_operand.hbm [shape: f32[4,32], index: 9, kind: input, shape index: {}]   ;;  %s4293_s10 = inlined_call_operand.hbm [shape: bf16[32,64], index: 10, kind: input, shape index: {}]   ;;  %s4294_s11 = inlined_call_operand.vmem [shape: f32[1,64], index: 11, kind: input, shape index: {}]   ;;  %s4295_s12 = inlined_call_operand.vmem [shape: bf16[64,32], index: 12, kind: input, shape index: {}]   ;;  %s4296_s13 = inlined_call_operand.vmem [shape: f32[1,32], index: 13, kind: input, shape index: {}]   ;;  %s4297_s14 = inlined_call_operand.hbm [shape: f32[2,8,32], index: 14, kind: output, shape index: {}]  }
   0x1   :  { %4327 = sst [smem:[#allocation38_spill]] %s4285_s2  ;;  %s19_s15 = sshll.u32 %s4283_s0, 4  ;;  %s20_s15 = int_to_ptr.vmem [resolvable:$true] %s19_s15 }
   0x2   :  { %4328 = sst [smem:[#allocation39_spill]] %s4287_s4  ;;  %s3129_s16 = scalar_lea.vmem %s20_s15, 16 }
   0x3   :  { %4329 = sst [smem:[#allocation40_spill]] %s4288_s5  ;;  %p3130_p0 = scmp.ne.s32.totalorder %s20_s15, %s3129_s16 }
   0x4   :  { %4330 = sst [smem:[#allocation41_spill]] %s4289_s6  ;;  %p3134_p1 = scmp.lt.s32.totalorder %s20_s15, %s20_s15 }
   0x5   :  { %4331 = sst [smem:[#allocation42_spill]] %s4290_s7  ;;  %p3135_p2 = scmp.lt.s32.totalorder %s3129_s16, %s3129_s16 }
   0x6   :  { %4332 = sst [smem:[#allocation43_spill]] %s4292_s9 }
   0x7   :  { %4333 = sst [smem:[#allocation44_spill]] %s4294_s11  ;;  %p3136_p3 = por %p3135_p2, %p3134_p1 }
   0x8   :  { %4334 = sst [smem:[#allocation45_spill]] %s4295_s12 }
   0x9   :  { %4335 = sst [smem:[#allocation46_spill]] %s4296_s13  ;;  %p3137_p4 = pnand %p3136_p3, %p3130_p0 }
   0xa   :  { %4336 = sst [smem:[#allocation47_spill]] %s4297_s14 }
   0xb   :  { %3140 = shalt.err (!%p3137_p4)  }
   0xc   :  { %s3501_s17 = smov [#allocation4]  }
   0xd   :  { %22 = dma.vmem_to_smem %s20_s15, 16, %s3501_s17, [#allocation3] }
   0xe   :  { %3451 = dma.done.wait [#allocation3], 16 }
   0xf   :  { %3452 = vsyncadd [#allocation3], 4294967280 }
  0x10   :  { %24 = sfence }
  0x11   :  { %25 = vsyncpa [#allocation6], 0 }
  0x12   :  { %27 = vsyncpa [#allocation6 + $0x1], 0 }
  0x13   :  { %28 = vsyncpa [#allocation9], 0 }
  0x14   :  { %30 = vsyncpa [#allocation9 + $0x1], 0 }
  0x15   :  { %31 = vsyncpa [#allocation12], 0 }
  0x16   :  { %32 = vsyncpa [#allocation15], 0 }
  0x17   :  { %33 = vsyncpa [#allocation18], 0 }
  0x18   :  { %34 = vsyncpa [#allocation7], 0 }
  0x19   :  { %36 = vsyncpa [#allocation7 + $0x1], 0  ;;  %s3601_s0 = smov 0   ;;  %s3603_s18 = smov 0  }
  0x1a   :  { %s3605_s19 = smov 0   ;;  %s3607_s20 = smov 0  }
  0x1b   :  { %s3609_s21 = smov 0   ;;  %s3611_s22 = smov 0  }
  0x1c LB: > { %4337 = sst [smem:[#allocation28_spill]] %s3479_s0  ;;  %s3632_s23 = sadd.s32 4294967295, %s3499_s22   ;;  %s3499_s22 = sphi %s3611_s22, %s42_s22   ;;  %s3495_s21 = sphi %s3609_s21, %s4393_s21   ;;  %s3491_s20 = sphi %s3607_s20, %s4392_s20   ;;  %s3487_s19 = sphi %s3605_s19, %s4396_s19   ;;  %s3483_s18 = sphi %s3603_s18, %s4395_s18   ;;  %s3479_s0 = sphi %s3601_s0, %s4394_s0  }
  0x1d   : > { %4338 = sst [smem:[#allocation29_spill]] %s3491_s20  ;;  %p2561_p5 = scmp.ge.s32.totalorder %s3499_s22, 1 }
  0x1e   : > { %4339 = sst [smem:[#allocation30_spill]] %s3495_s21  ;;  %p4299_p6 = scmp.eq.s32.totalorder %s3632_s23, 0 }
  0x1f   : > { %4340 = sst [smem:[#allocation31_spill]] %s3499_s22  ;;  %p377_p7 = scmp.lt.s32.totalorder %s3499_s22, 3 }
  0x20   : > { %4341 = sst [smem:[#allocation32_spill]] %s3632_s23  ;;  %s3502_s25 = smov [#allocation11]  }
  0x21   : > { %p3637_p8 = pnand %p2561_p5, %p377_p7  ;;  %s390_s26 = sshll.u32 %s3502_s25, 4  ;;  %s391_s26 = int_to_ptr.vmem [resolvable:$true] %s390_s26 }
  0x22   : > { %s3503_s27 = smov [#allocation14]   ;;  %s3504_s30 = smov [#allocation17]  }
  0x23   : > { %s4342_s24 = scalar_select %p3637_p8, 1, 0 }
  0x24   : > { %p2945_p10 = pneg %p3637_p8  ;;  %s415_s28 = sshll.u32 %s3503_s27, 4  ;;  %s3650_s28 = int_to_ptr.vmem [resolvable:$true] %s415_s28 }
  0x25   : > { %s439_s15 = sshll.u32 %s3504_s30, 4  ;;  %s4344_s4 = sld [smem:[#allocation39_spill]]  ;;  %s3652_s15 = int_to_ptr.vmem [resolvable:$true] %s439_s15 }
  0x26   : > { %p3646_p11 = pnand %p2945_p10, %p4299_p6 }
  0x28   : > { %s4343_s29 = scalar_select %p3646_p11, 1, 0 }
  0x29   : > { %p3662_p13 = pneg %p3646_p11 }
  0x2b   : > { %s3141_s25 = scalar_lea.hbm %s4344_s4, 64 }
  0x2c   : > { %p3142_p12 = scmp.ne.s32.totalorder %s4344_s4, %s3141_s25  ;;  %p3148_p2 = scmp.lt.u32.totalorder %s3141_s25, %s4344_s4 }
  0x2d   : > { %s4345_s27 = scalar_select %p3662_p13, 1, 0 }
  0x2e   : > { %p3144_p0 = pnand %p3662_p13, %p3142_p12 }
  0x30   : > { %p3145_p1 = pneg %p3144_p0 }
  0x32   : > { %p3150_p3 = pnand %p3148_p2, %p3145_p1 }
  0x34   : > { %3153 = shalt.err (!%p3150_p3)
}
  0x35   : > { %s3154_s16 = scalar_lea.vmem %s391_s26, 64  ;;  %p3162_p10 = scmp.lt.s32.totalorder %s391_s26, %s391_s26 }
  0x36   : > { %p3155_p4 = scmp.ne.s32.totalorder %s391_s26, %s3154_s16  ;;  %p3163_p9 = scmp.lt.s32.totalorder %s3154_s16, %s3154_s16 }
  0x38   : > { %p3157_p5 = pnand %p3155_p4, %p3662_p13  ;;  %p3164_p6 = por %p3163_p9, %p3162_p10 }
  0x3a   : > { %p3158_p7 = pneg %p3157_p5 }
  0x3c   : > { %p3165_p8 = pnand %p3164_p6, %p3158_p7 }
  0x3e   : > { %3168 = shalt.err (!%p3165_p8)
}
  0x3f   : > { %2948 = dma.hbm_to_vmem [thread:$0]  (!%p3646_p11), %s4344_s4, 64, %s391_s26, [#allocation12]  }
  0x40   : > { %s4346_s7 = sld [smem:[#allocation42_spill]] }
  0x46   : > { %s3169_s25 = scalar_lea.hbm %s4346_s7, 64 }
  0x47   : > { %p3170_p12 = scmp.ne.s32.totalorder %s4346_s7, %s3169_s25  ;;  %p3176_p6 = scmp.lt.u32.totalorder %s3169_s25, %s4346_s7 }
  0x49   : > { %p3172_p0 = pnand %p3170_p12, %p3662_p13 }
  0x4b   : > { %p3173_p9 = pneg %p3172_p0 }
  0x4d   : > { %p3178_p8 = pnand %p3176_p6, %p3173_p9 }
  0x4f   : > { %3181 = shalt.err (!%p3178_p8)
}
  0x50   : > { %s3182_s26 = scalar_lea.vmem %s3650_s28, 64  ;;  %p3190_p4 = scmp.lt.s32.totalorder %s3650_s28, %s3650_s28 }
  0x51   : > { %p3183_p1 = scmp.ne.s32.totalorder %s3650_s28, %s3182_s26  ;;  %p3191_p5 = scmp.lt.s32.totalorder %s3182_s26, %s3182_s26 }
  0x53   : > { %p3185_p2 = pnand %p3183_p1, %p3662_p13  ;;  %p3192_p7 = por %p3191_p5, %p3190_p4 }
  0x55   : > { %p3186_p3 = pneg %p3185_p2 }
  0x57   : > { %p3193_p10 = pnand %p3192_p7, %p3186_p3 }
  0x59   : > { %3196 = shalt.err (!%p3193_p10)
}
  0x5a   : > { %2954 = dma.hbm_to_vmem [thread:$0]  (!%p3646_p11), %s4346_s7, 64, %s3650_s28, [#allocation15]  }
  0x5b   : > { %s4347_s9 = sld [smem:[#allocation43_spill]] }
  0x61   : > { %s3197_s11 = scalar_lea.hbm %s4347_s9, 64 }
  0x62   : > { %p3198_p12 = scmp.ne.s32.totalorder %s4347_s9, %s3197_s11  ;;  %p3204_p6 = scmp.lt.u32.totalorder %s3197_s11, %s4347_s9 }
  0x64   : > { %p3200_p0 = pnand %p3198_p12, %p3662_p13 }
  0x66   : > { %p3201_p9 = pneg %p3200_p0 }
  0x68   : > { %p3206_p8 = pnand %p3204_p6, %p3201_p9 }
  0x6a   : > { %3209 = shalt.err (!%p3206_p8)
}
  0x6b   : > { %s3210_s28 = scalar_lea.vmem %s3652_s15, 64  ;;  %p3218_p4 = scmp.lt.s32.totalorder %s3652_s15, %s3652_s15 }
  0x6c   : > { %p3211_p1 = scmp.ne.s32.totalorder %s3652_s15, %s3210_s28  ;;  %p3219_p5 = scmp.lt.s32.totalorder %s3210_s28, %s3210_s28 }
  0x6e   : > { %p3213_p2 = pnand %p3211_p1, %p3662_p13  ;;  %p3220_p7 = por %p3219_p5, %p3218_p4 }
  0x70   : > { %p3214_p3 = pneg %p3213_p2 }
  0x72   : > { %p3221_p10 = pnand %p3220_p7, %p3214_p3 }
  0x74   : > { %3224 = shalt.err (!%p3221_p10)
}
  0x75   : > { %2960 = dma.hbm_to_vmem [thread:$0]  (!%p3646_p11), %s4347_s9, 64, %s3652_s15, [#allocation18]  }
  0x76   : > { %s2560_s20 = sadd.s32 4294967294, %s3499_s22   ;;  %s54_s13 = sadd.s32 1, %s3495_s21 }
  0x77   : > { %s63_s14 = sadd.s32 1, %s3487_s19  ;;  %p56_p12 = scmp.ge.s32.totalorder %s54_s13, 2 }
  0x78   : > { %p70_p0 = scmp.ne.s32.totalorder %s3487_s19, %s3483_s18  ;;  %p71_p9 = scmp.eq.s32.totalorder %s3499_s22, 0 }
  0x79   : > { %p76_p6 = scmp.ne.s32.totalorder %s3483_s18, %s3479_s0  ;;  %s4398_s13 = smov (%p56_p12, %s54_s13), 0 }
  0x7a   : > { %4348 = sst [smem:[#allocation33_spill]] %s4398_s13  ;;  %p3734_p8 = por %p71_p9, %p70_p0 }
  0x7b   : > { %p4350_p1 = scmp.eq.s32.totalorder %s3632_s23, 0  ;;  %s58_s17 = ssub.s32 %s3495_s21, %s4398_s13 }
  0x7c   : > { %p364_p3 = scmp.eq.s32.totalorder %s3632_s23, 1  ;;  %p61_p4 = scmp.eq.s32.totalorder %s58_s17, 0 }
  0x7d   : > { %p3740_p2 = por %p4350_p1, %p76_p6  ;;  %p370_p5 = scmp.eq.s32.totalorder %s2560_s20, 1 }
  0x7e   : > { %p3747_p7 = por %p364_p3, %p70_p0  ;;  %p2984_p10 = scmp.lt.s32.totalorder %s3499_s22, 2 }
  0x7f   : > { %s4351_s15 = scalar_select %p3740_p2, 1, 0 }
  0x80   : > { %s4353_s25 = scalar_select %p3747_p7, 1, 0 }
  0x81   : > { %4352 = sst [smem:[#allocation34_spill]] %s4351_s15  ;;  %p3755_p12 = por %p370_p5, %p76_p6 }
  0x82   : > { %4354 = sst [smem:[#allocation35_spill]] %s4353_s25  ;;  %s4303_s28 = sand.u32 1, %s3487_s19  }
  0x83   : > { %s3753_s30 = scalar_select %p61_p4, %s3487_s19, %s63_s14  }
  0x84   : > { %s4356_s16 = scalar_select %p3755_p12, 1, 0 }
  0x85   : > { %4355 = sst [smem:[#allocation36_spill]] %s3753_s30  ;;  %s3762_s26 = sshll.u32 %s4303_s28, 3 }
  0x86   : > { %4357 = sst [smem:[#allocation37_spill]] %s4356_s16  ;;  %s3765_s12 = sshll.u32 %s3495_s21, 7 }
  0x87   : > { %p3769_p0 = pnand %p2984_p10, %p3734_p8  ;;  %s491_s14 = sand.u32 1, %s3499_s22  }
  0x88   : > { %s4359_s2 = sld [smem:[#allocation38_spill]]  ;;  %s495_s28 = scalar_lea.vmem [#allocation8], %s3762_s26 }
  0x89   : > { %s4358_s20 = scalar_select %p3769_p0, 1, 0 }
  0x8a   : > { %s502_s9 = sshll.u32 %s495_s28, 4  ;;  %s3783_s11 = scalar_lea.sflag [#allocation9], %s491_s14  ;;  %s3781_s9 = int_to_ptr.vmem [resolvable:$true] %s502_s9 }
  0x8b   : > { %p3789_p6 = pneg %p3769_p0 }
  0x8d   : > { %s4360_s21 = scalar_select %p3789_p6, 1, 0 }
  0x8e   : > { %s3778_s7 = scalar_lea.hbm %s4359_s2, %s3765_s12  ;;  %s3230_s30 = scalar_lea.hbm %s4359_s2, 256 }
  0x8f   : > { %s3225_s13 = scalar_lea.hbm %s3778_s7, 128  ;;  %p3231_p3 = scmp.lt.u32.totalorder %s3778_s7, %s4359_s2 }
  0x90   : > { %p3226_p9 = scmp.ne.s32.totalorder %s3778_s7, %s3225_s13  ;;  %p3232_p4 = scmp.lt.u32.totalorder %s3230_s30, %s3225_s13 }
  0x91   : > { %p3234_p10 = scmp.lt.u32.totalorder %s3225_s13, %s3778_s7 }
  0x92   : > { %p3228_p8 = pnand %p3789_p6, %p3226_p9  ;;  %p3233_p5 = por %p3232_p4, %p3231_p3 }
  0x94   : > { %p3229_p1 = pneg %p3228_p8  ;;  %p3235_p12 = por %p3234_p10, %p3233_p5 }
  0x96   : > { %p3236_p7 = pnand %p3235_p12, %p3229_p1 }
  0x98   : > { %3239 = shalt.err (!%p3236_p7)
}
  0x99   : > { %s3240_s14 = scalar_lea.vmem %s3781_s9, 128  ;;  %s3505_s4 = smov [#allocation8]  }
  0x9a   : > { %p3241_p9 = scmp.ne.s32.totalorder %s3781_s9, %s3240_s14  ;;  %s3245_s17 = sshll.u32 %s3505_s4, 4  ;;  %s3246_s17 = int_to_ptr.vmem [resolvable:$false] %s3245_s17 }
  0x9b   : > { %s3247_s22 = scalar_lea.vmem %s3246_s17, 256  ;;  %p3248_p11 = scmp.lt.s32.totalorder %s3781_s9, %s3246_s17 }
  0x9c   : > { %p3243_p8 = pnand %p3241_p9, %p3789_p6  ;;  %p3249_p13 = scmp.lt.s32.totalorder %s3247_s22, %s3240_s14 }
  0x9e   : > { %p3244_p2 = pneg %p3243_p8  ;;  %p3250_p3 = por %p3249_p13, %p3248_p11 }
  0xa0   : > { %p3251_p4 = pnand %p3250_p3, %p3244_p2 }
  0xa2   : > { %3254 = shalt.err (!%p3251_p4)
}
  0xa3   : > { %2970 = dma.hbm_to_vmem [thread:$0]  (!%p3769_p0), %s3778_s7, 128, %s3781_s9, %s3783_s11  }
  0xa4   : > { %s3817_s28 = scalar_lea.hbm %s4286_s3, %s3765_s12  ;;  %s513_s4 = scalar_lea.vmem [#allocation10], %s3762_s26 }
  0xa5   : > { %s3820_s17 = sshll.u32 %s513_s4, 4  ;;  %s3506_s14 = smov [#allocation13]   ;;  %s3889_s17 = int_to_ptr.vmem [resolvable:$true] %s3820_s17 }
  0xa6   : > { %s401_s22 = sshll.u32 %s3506_s14, 4  ;;  %s4361_s5 = sld [smem:[#allocation40_spill]]  ;;  %s402_s22 = int_to_ptr.vmem [resolvable:$true] %s401_s22 }
  0xa7   : > { %p4362_p13 = scmp.ne.s32.totalorder %s4345_s27, 0 }
  0xac   : > { %s3255_s0 = scalar_lea.hbm %s4361_s5, 64 }
  0xad   : > { %p3256_p11 = scmp.ne.s32.totalorder %s4361_s5, %s3255_s0  ;;  %p3262_p12 = scmp.lt.u32.totalorder %s3255_s0, %s4361_s5 }
  0xaf   : > { %p3258_p2 = pnand %p3256_p11, %p4362_p13 }
  0xb1   : > { %p3259_p7 = pneg %p3258_p2 }
  0xb3   : > { %p3264_p1 = pnand %p3262_p12, %p3259_p7 }
  0xb5   : > { %3267 = shalt.err (!%p3264_p1)
}
  0xb6   : > { %s3268_s13 = scalar_lea.vmem %s402_s22, 64  ;;  %p3276_p8 = scmp.lt.s32.totalorder %s402_s22, %s402_s22 }
  0xb7   : > { %p3269_p5 = scmp.ne.s32.totalorder %s402_s22, %s3268_s13  ;;  %p3277_p3 = scmp.lt.s32.totalorder %s3268_s13, %s3268_s13 }
  0xb9   : > { %p3271_p10 = pnand %p3269_p5, %p4362_p13  ;;  %p3278_p4 = por %p3277_p3, %p3276_p8 }
  0xbb   : > { %p3272_p9 = pneg %p3271_p10 }
  0xbd   : > { %p3279_p0 = pnand %p3278_p4, %p3272_p9 }
  0xbf   : > { %3282 = shalt.err (!%p3279_p0)
}
  0xc0   : > { %p4363_p11 = scmp.ne.s32.totalorder %s4343_s29, 0  ;;  %s3507_s0 = smov [#allocation16]  }
  0xc1   : > { %s425_s25 = sshll.u32 %s3507_s0, 4  ;;  %s3283_s4 = scalar_lea.hbm %s4291_s8, 1024  ;;  %s426_s25 = int_to_ptr.vmem [resolvable:$true] %s425_s25 }
  0xc2   : > { %2951 = dma.hbm_to_vmem [thread:$0]  (!%p4363_p11), %s4361_s5, 64, %s402_s22, [#allocation12]  }
  0xc3   : > { %p3284_p2 = scmp.ne.s32.totalorder %s4291_s8, %s3283_s4  ;;  %p3290_p12 = scmp.lt.u32.totalorder %s3283_s4, %s4291_s8 }
  0xc5   : > { %p3286_p0 = pnand %p3284_p2, %p4362_p13 }
  0xc7   : > { %p3287_p7 = pneg %p3286_p0 }
  0xc9   : > { %p3292_p1 = pnand %p3290_p12, %p3287_p7 }
  0xcb   : > { %3295 = shalt.err (!%p3292_p1)
}
  0xcc   : > { %s3296_s22 = scalar_lea.vmem %s426_s25, 1024  ;;  %p3304_p8 = scmp.lt.s32.totalorder %s426_s25, %s426_s25 }
  0xcd   : > { %p3297_p5 = scmp.ne.s32.totalorder %s426_s25, %s3296_s22  ;;  %p3305_p3 = scmp.lt.s32.totalorder %s3296_s22, %s3296_s22 }
  0xcf   : > { %p3299_p10 = pnand %p3297_p5, %p4362_p13  ;;  %p3306_p4 = por %p3305_p3, %p3304_p8 }
  0xd1   : > { %p3300_p9 = pneg %p3299_p10 }
  0xd3   : > { %p3307_p6 = pnand %p3306_p4, %p3300_p9 }
  0xd5   : > { %3310 = shalt.err (!%p3307_p6)
}
  0xd6   : > { %s3508_s2 = smov 64   ;;  %s3509_s6 = smov 4  }
  0xd7   : > { %2957 = dma.hbm_to_vmem [thread:$0]  (!%p4363_p11), %s4291_s8, 1024, %s426_s25, [#allocation15], %s3508_s2, %s3508_s2, %s3509_s6  }
  0xd8   : > { %s3510_s30 = smov [#allocation19]   ;;  %s3865_s9 = scalar_lea.hbm %s4284_s1, %s3765_s12 }
  0xd9   : > { %s449_s4 = sshll.u32 %s3510_s30, 4  ;;  %s3311_s5 = scalar_lea.hbm %s4293_s10, 256  ;;  %s450_s4 = int_to_ptr.vmem [resolvable:$true] %s449_s4 }
  0xda   : > { %p3312_p6 = scmp.ne.s32.totalorder %s4293_s10, %s3311_s5  ;;  %p3318_p7 = scmp.lt.u32.totalorder %s3311_s5, %s4293_s10 }
  0xdc   : > { %p3314_p2 = pnand %p3312_p6, %p4362_p13 }
  0xde   : > { %p3315_p0 = pneg %p3314_p2 }
  0xe0   : > { %p3320_p12 = pnand %p3318_p7, %p3315_p0 }
  0xe2   : > { %3323 = shalt.err (!%p3320_p12)
}
  0xe3   : > { %s3324_s16 = scalar_lea.vmem %s450_s4, 256  ;;  %p3332_p9 = scmp.lt.s32.totalorder %s450_s4, %s450_s4 }
  0xe4   : > { %p3325_p1 = scmp.ne.s32.totalorder %s450_s4, %s3324_s16  ;;  %p3333_p8 = scmp.lt.s32.totalorder %s3324_s16, %s3324_s16 }
  0xe6   : > { %p3327_p5 = pnand %p3325_p1, %p4362_p13  ;;  %p3334_p3 = por %p3333_p8, %p3332_p9 }
  0xe8   : > { %p3328_p10 = pneg %p3327_p5 }
  0xea   : > { %p3335_p4 = pnand %p3334_p3, %p3328_p10 }
  0xec   : > { %3338 = shalt.err (!%p3335_p4)
}
  0xed   : > { %2963 = dma.hbm_to_vmem [thread:$0]  (!%p4363_p11), %s4293_s10, 256, %s450_s4, [#allocation18], %s3508_s2, %s3508_s2, %s3509_s6  }
  0xee   : > { %s476_s27 = scalar_lea.vmem [#allocation5], %s3762_s26  ;;  %s4364_s29 = sand.u32 1, %s3487_s19  }
  0xef   : > { %s484_s15 = sshll.u32 %s476_s27, 4  ;;  %s473_s12 = scalar_lea.sflag [#allocation6], %s4364_s29  ;;  %s485_s15 = int_to_ptr.vmem [resolvable:$true] %s484_s15 }
  0xf0   : > { %s3339_s30 = scalar_lea.hbm %s3865_s9, 128  ;;  %p4365_p6 = scmp.ne.s32.totalorder %s4360_s21, 0 }
  0xf1   : > { %p3340_p13 = scmp.ne.s32.totalorder %s3865_s9, %s3339_s30  ;;  %s3344_s13 = scalar_lea.hbm %s4284_s1, 256 }
  0xf2   : > { %p3345_p11 = scmp.lt.u32.totalorder %s3865_s9, %s4284_s1  ;;  %p3346_p7 = scmp.lt.u32.totalorder %s3344_s13, %s3339_s30 }
  0xf3   : > { %p3342_p2 = pnand %p3340_p13, %p4365_p6  ;;  %p3348_p1 = scmp.lt.u32.totalorder %s3339_s30, %s3865_s9 }
  0xf4   : > { %p3347_p12 = por %p3346_p7, %p3345_p11 }
  0xf5   : > { %p3343_p0 = pneg %p3342_p2 }
  0xf6   : > { %p3349_p5 = por %p3348_p1, %p3347_p12 }
  0xf8   : > { %p3350_p10 = pnand %p3349_p5, %p3343_p0 }
  0xfa   : > { %3353 = shalt.err (!%p3350_p10)
}
  0xfb   : > { %s3354_s26 = scalar_lea.vmem %s485_s15, 128  ;;  %s3511_s4 = smov [#allocation5]  }
  0xfc   : > { %p3355_p9 = scmp.ne.s32.totalorder %s485_s15, %s3354_s26  ;;  %s3359_s0 = sshll.u32 %s3511_s4, 4  ;;  %s3360_s0 = int_to_ptr.vmem [resolvable:$false] %s3359_s0 }
  0xfd   : > { %s3361_s16 = scalar_lea.vmem %s3360_s0, 256  ;;  %p3362_p4 = scmp.lt.s32.totalorder %s485_s15, %s3360_s0 }
  0xfe   : > { %p3357_p8 = pnand %p3355_p9, %p4365_p6  ;;  %p3363_p13 = scmp.lt.s32.totalorder %s3361_s16, %s3354_s26 }
 0x100   : > { %p3358_p3 = pneg %p3357_p8  ;;  %p3364_p2 = por %p3363_p13, %p3362_p4 }
 0x102   : > { %p3365_p7 = pnand %p3364_p2, %p3358_p3 }
 0x104   : > { %3368 = shalt.err (!%p3365_p7)
}
 0x105   : > { %p4366_p11 = scmp.ne.s32.totalorder %s4358_s20, 0  ;;  %s3369_s23 = scalar_lea.hbm %s3817_s28, 128 }
 0x106   : > { %p3370_p0 = scmp.ne.s32.totalorder %s3817_s28, %s3369_s23  ;;  %s3374_s29 = scalar_lea.hbm %s4286_s3, 256 }
 0x107   : > { %2967 = dma.hbm_to_vmem [thread:$0]  (!%p4366_p11), %s3865_s9, 128, %s485_s15, %s473_s12  }
 0x108   : > { %p3372_p12 = pnand %p3370_p0, %p4365_p6  ;;  %p3375_p5 = scmp.lt.u32.totalorder %s3817_s28, %s4286_s3 }
 0x109   : > { %p3376_p10 = scmp.lt.u32.totalorder %s3374_s29, %s3369_s23  ;;  %p3378_p8 = scmp.lt.u32.totalorder %s3369_s23, %s3817_s28 }
 0x10a   : > { %p3373_p1 = pneg %p3372_p12 }
 0x10b   : > { %p3377_p9 = por %p3376_p10, %p3375_p5 }
 0x10d   : > { %p3379_p3 = por %p3378_p8, %p3377_p9 }
 0x10f   : > { %p3380_p4 = pnand %p3379_p3, %p3373_p1 }
 0x111   : > { %3383 = shalt.err (!%p3380_p4)
}
 0x112   : > { %s3384_s9 = scalar_lea.vmem %s3889_s17, 128  ;;  %s3512_s15 = smov [#allocation10]  }
 0x113   : > { %p3385_p13 = scmp.ne.s32.totalorder %s3889_s17, %s3384_s9  ;;  %s3389_s12 = sshll.u32 %s3512_s15, 4  ;;  %s3390_s12 = int_to_ptr.vmem [resolvable:$false] %s3389_s12 }
 0x114   : > { %s3391_s7 = scalar_lea.vmem %s3390_s12, 256  ;;  %p3392_p0 = scmp.lt.s32.totalorder %s3889_s17, %s3390_s12 }
 0x115   : > { %p3387_p2 = pnand %p3385_p13, %p4365_p6  ;;  %p3393_p12 = scmp.lt.s32.totalorder %s3391_s7, %s3384_s9 }
 0x117   : > { %p3388_p7 = pneg %p3387_p2  ;;  %p3394_p5 = por %p3393_p12, %p3392_p0 }
 0x119   : > { %p3395_p10 = pnand %p3394_p5, %p3388_p7 }
 0x11b   : > { %3398 = shalt.err (!%p3395_p10)
}
 0x11c   : > { %2973 = dma.hbm_to_vmem [thread:$0]  (!%p4366_p11), %s3817_s28, 128, %s3889_s17, %s3783_s11, %s3508_s2, %s3508_s2, %s3509_s6  }
 0x11d   : > { %p4367_p6 = scmp.ne.s32.totalorder %s4342_s24, 0 }
 0x11e   : > { %s4368_s21 = sld [smem:[#allocation34_spill]] (!%p4367_p6)  ;;  %s3939_s13 = sand.u32 (!%p4367_p6), 1, %s3483_s18  }
 0x11f   : > { %532 = sbr.rel (%p4367_p6) target bundleno = 4692 (0x1254), region = 72  ;;  %s3942_s22 = sshll.u32 (!%p4367_p6), %s3939_s13, 3 }
 0x120   : > { %s535_s20 = scalar_lea.sflag (!%p4367_p6), [#allocation6], %s3939_s13  ;;  %s538_s25 = scalar_lea.vmem (!%p4367_p6), [#allocation5], %s3942_s22 }
 0x124   : > { %p4369_p1 = scmp.ne.s32.totalorder (!%p4367_p6), %s4368_s21, 0 }
 0x126   : > { %3454 = dma.done.wait (%p4369_p1), %s535_s20, 128  }
 0x127   : > { %3456 = vsyncadd (%p4369_p1), %s535_s20, 4294967168  ;;  %s4370_s11 = sld [smem:[#allocation32_spill]]  ;;  %s547_s17 = scalar_lea.vmem [#allocation8], %s3942_s22 }
 0x12d   : > { %s543_s24 = sand.u32 1, %s4370_s11  }
 0x12e   : > { %s544_s28 = scalar_lea.sflag [#allocation9], %s543_s24 }
 0x12f   : > { %3458 = dma.done.wait (%p4369_p1), %s544_s28, 256  }
 0x130   : > { %3460 = vsyncadd (%p4369_p1), %s544_s28, 4294967040  ;;  %s556_s2 = scalar_lea.vmem [#allocation10], %s3942_s22  ;;  %p4371_p11 = scmp.eq.s32.totalorder %s4370_s11, 0 }
 0x132   : > { %3462 = dma.done.wait (%p4371_p11), [#allocation12], 128   ;;  %p4372_p9 = pmov %p4371_p11 }
 0x134   : > { %3464 = vsyncadd (%p4372_p9), [#allocation12], 4294967168  ;;  %p4373_p8 = pmov %p4372_p9 }
 0x136   : > { %3466 = dma.done.wait (%p4373_p8), [#allocation15], 1088   ;;  %p4374_p3 = pmov %p4373_p8 }
 0x138   : > { %3468 = vsyncadd (%p4374_p3), [#allocation15], 4294966208  ;;  %p4375_p4 = pmov %p4374_p3 }
 0x139   : > { %p4376_p13 = pmov %p4374_p3 }
 0x13a   : > { %3470 = dma.done.wait (%p4375_p4), [#allocation18], 320  }
 0x13b   : > { %3472 = vsyncadd (%p4376_p13), [#allocation18], 4294966976  ;;  %vm653_vm0 = vcmask 261120   ;;  %v635_v0 = vld [vmem:[%s547_s17] sm:$0xff]  ;;  %v3969_v1 = vld [vmem:[%s538_s25] sm:$0xff]  ;;  %s4377_s4 = sld [smem:[#allocation41_spill]] }
 0x13c   : > { %v686_v2 = vsel %vm653_vm0, %v635_v0, 0.0  ;;  %v654_v3 = vsel %vm653_vm0, %v3969_v1, 0.0  ;;  %v3513_v16 = vmov 0.0   ;;  %vm3514_vm1 = vmmov 0   ;;  %v2587_v35 = vld [vmem:[#allocation11] ss:$0 sm:$0xff] }
 0x13d   : > { %687 = vadd.xlane.f32.xlu0 %v686_v2  ;;  %2741 = vmatprep.subr.bf16.mxu1 %v3513_v16  ;;  %v2588_v38 = vld [vmem:[#allocation13] ss:$0 sm:$0xff]  ;;  %v2597_v49 = vld [vmem:[#allocation14 + $0x1] ss:$0 sm:$0xff]  ;;  %v2589_v54 = vld [vmem:[#allocation14] ss:$0 sm:$0xff] }
 0x13e   : > { %2733 = vmatprep.subr.bf16.mxu0 %v3513_v16  ;;  %2745 = vmatprep.mubr.msk.bf16.mxu1 %vm3514_vm1, %v3513_v16  ;;  %vm904_vm6 = vcmask 64512   ;;  %s3515_s12 = smov 120   ;;  %s3516_s7 = smov 104   ;;  %v2605_v2 = vld [vmem:[#allocation14 + $0x2] ss:$0 sm:$0xff]  ;;  %vm966_vm7 = vcmask 1043456  }
 0x13f   : > { %2737 = vmatprep.mubr.msk.bf16.mxu0 %vm3514_vm1, %v3513_v16  ;;  %s3517_s21 = smov 112   ;;  %s3519_s20 = smov 8   ;;  %vm1128_vm9 = vcmask 130112   ;;  %vm1244_vm10 = vcmask 195712   ;;  %vm1360_vm11 = vcmask 261312   ;;  %vm1711_vm15 = vcmask 130048  }
 0x140   : > { %s3520_s25 = smov 16   ;;  %s3521_s6 = smov 24  }
 0x141   : > { %655 = vadd.xlane.f32.xlu0 %v654_v3  ;;  %v3058_v14 = vld [vmem:[%s4377_s4 + $0x10] sm:$0xff]   ;;  %v3059_v15 = vld [vmem:[%s4377_s4] sm:$0xff]   ;;  %v3060_v17 = vld [vmem:[%s4377_s4 + $0x18] sm:$0xff]   ;;  %s4379_s23 = sld [smem:[#allocation45_spill]]  ;;  %s4382_s11 = sld [smem:[#allocation35_spill]] }
 0x142   : > { %2742 = vmatpush3.bf16.msra.mxu1 %v3058_v14  ;;  %2734 = vmatpush3.bf16.msra.mxu0 %v3059_v15  ;;  %v3061_v18 = vld [vmem:[%s4377_s4 + $0x8] sm:$0xff]   ;;  %v3062_v46 = vld [vmem:[%s4377_s4 + $0x20] sm:$0xff]   ;;  %s632_s28 = scalar_lea.vmem [#allocation20], %s3942_s22  ;;  %s4383_s0 = sld [smem:[#allocation47_spill]] }
 0x143   : > { %2743 = vmatprep.subr.bf16.mxu1 %v3513_v16  ;;  %2735 = vmatprep.subr.bf16.mxu0 %v3513_v16  ;;  %v3063_v48 = vld [vmem:[%s4377_s4 + $0x28] sm:$0xff]   ;;  %s2379_s17 = sshll.u32 %s632_s28, 4  ;;  %s2365_s22 = scalar_lea.sflag [#allocation7], %s3939_s13  ;;  %s4235_s17 = int_to_ptr.vmem [resolvable:$true] %s2379_s17 }
 0x144   : > { %s3522_s27 = smov [#allocation20]  }
 0x145   : > { %s3403_s29 = sshll.u32 %s3522_s27, 4  ;;  %s3404_s29 = int_to_ptr.vmem [resolvable:$false] %s3403_s29 }
 0x146   : > { %2744 = vmatpush3.bf16.msra.mxu1 %v3060_v17  ;;  %2736 = vmatpush3.bf16.msra.mxu0 %v3061_v18  ;;  %s3405_s30 = scalar_lea.vmem %s3404_s29, 256  ;;  %p3406_p5 = scmp.lt.s32.totalorder %s4235_s17, %s3404_s29 }
 0x147   : > { %2757 = vmatprep.subr.bf16.mxu1 %v3513_v16  ;;  %2749 = vmatprep.subr.bf16.mxu0 %v3513_v16  ;;  %p4385_p7 = scmp.ne.s32.totalorder %s4382_s11, 0 }
 0x148   : > { %s4384_s16 = smov %s4383_s0 }
 0x1ca   : > { %v688_v4 = vpop.xlane.xlu0 %687 }
 0x1cb   : > { %v689_v5 = vmul.f32 0.03125, %v688_v4 }
 0x1cd   : > { %v690_v6 = vsub.f32 %v635_v0, %v689_v5 }
 0x1ce   : > { %v656_v7 = vpop.xlane.xlu0 %655 }
 0x1cf   : > { %v658_v8 = vmul.f32 0.03125, %v656_v7  ;;  %v691_v9 = vmul.f32 %v690_v6, %v690_v6  ;;  %v705_v36 = vmul.f32 %v2587_v35, %v690_v6 }
 0x1d1   : > { %v659_v10 = vsub.f32 %v3969_v1, %v658_v8  ;;  %v692_v11 = vsel %vm653_vm0, %v691_v9, 0.0 }
 0x1d2   : > { %693 = vadd.xlane.f32.xlu1 %v692_v11 }
 0x1d3   : > { %v660_v12 = vmul.f32 %v659_v10, %v659_v10  ;;  %v678_v40 = vmul.f32 %v2587_v35, %v659_v10 }
 0x1d5   : > { %v661_v13 = vsel %vm653_vm0, %v660_v12, 0.0 }
 0x1d6   : > { %662 = vadd.xlane.f32.xlu1 %v661_v13 }
 0x25f   : > { %v694_v19 = vpop.xlane.xlu1 %693 }
 0x260   : > { %v695_v20 = vmul.f32 0.032258064, %v694_v19 }
 0x262   : > { %3081 = vrsqrt.f32 %v695_v20  ;;  %vm698_vm2 = vcmp.eq.f32.partialorder %v695_v20, inf  ;;  %v701_v25 = vand.u32 2147483648, %v695_v20  ;;  %vm700_vm3 = vcmp.eq.f32.partialorder %v695_v20, 0.0 }
 0x263   : > { %v663_v21 = vpop.xlane.xlu1 %662 }
 0x264   : > { %v664_v22 = vmul.f32 0.032258064, %v663_v21 }
 0x266   : > { %3083 = vrsqrt.f32 %v664_v22  ;;  %vm667_vm4 = vcmp.eq.f32.partialorder %v664_v22, inf  ;;  %v670_v31 = vand.u32 2147483648, %v664_v22  ;;  %vm669_vm5 = vcmp.eq.f32.partialorder %v664_v22, 0.0 }
 0x26c   : > { %v3082_v23 = vpop.eup %3081 }
 0x26d   : > { %v697_v24 = vmul.f32 %v3082_v23, %v695_v20  ;;  %v3518_v23 = vmov -1e+09  }
 0x26f   : > { %v699_v26 = vsel %vm698_vm2, %v695_v20, %v697_v24  ;;  %v639_v20 = vlaneseq }
 0x270   : > { %v3084_v27 = vpop.eup %3083  ;;  %v702_v28 = vsel %vm700_vm3, %v701_v25, %v699_v26  ;;  %vm2318_vm3 = vcmask 523264  }
 0x271   : > { %v703_v29 = vadd.f32 1e-06, %v702_v28  ;;  %v666_v30 = vmul.f32 %v3084_v27, %v664_v22  ;;  %v640_v21 = vshrl.u32 %v639_v20, 7 }
 0x273   : > { %v668_v32 = vsel %vm667_vm4, %v664_v22, %v666_v30  ;;  %3085 = vrcp.f32 %v703_v29  ;;  %v4047_v22 = vand.u32 127, %v639_v20 }
 0x274   : > { %v671_v33 = vsel %vm669_vm5, %v670_v31, %v668_v32 }
 0x275   : > { %v672_v34 = vadd.f32 1e-06, %v671_v33  ;;  %vm645_vm8 = vcmp.le.s32.totalorder %v4047_v22, %v640_v21 }
 0x276   : > { %v646_v24 = vsel %vm645_vm8, 0.0, %v3518_v23 }
 0x277   : > { %3087 = vrcp.f32 %v672_v34 }
 0x27d   : > { %v3086_v37 = vpop.eup %3085 }
 0x27e   : > { %v706_v39 = vmul.f32 %v3086_v37, %v705_v36 }
 0x280   : > { %v707_v41 = vadd.f32 %v2588_v38, %v706_v39 }
 0x281   : > { %v3088_v42 = vpop.eup %3087 }
 0x282   : > { %v708_v43 = vpack.c.bf16 %v707_v41, %v707_v41  ;;  %v679_v44 = vmul.f32 %v3088_v42, %v678_v40 }
 0x284   : > { %2746 = vmatmul.mubr.msk.bf16.vlgmr.msra.gmra.mrb[0].mxu1 %vm653_vm0, %v708_v43  ;;  %v684_v45 = vadd.f32 %v2588_v38, %v679_v44 }
 0x285   : > { %2759 = vmatprep.mubr.msk.bf16.mxu1 %vm3514_vm1, %v3513_v16 }
 0x286   : > { %v685_v47 = vpack.c.bf16 %v684_v45, %v684_v45 }
 0x288   : > { %2738 = vmatmul.mubr.msk.bf16.vlgmr.msra.gmra.mrb[0].mxu0 %vm653_vm0, %v685_v47 }
 0x289   : > { %2750 = vmatpush3.bf16.msra.mxu0 %v3062_v46  ;;  %2753 = vmatprep.mubr.msk.bf16.mxu0 %vm3514_vm1, %v3513_v16 }
 0x28a   : > { %2751 = vmatprep.subr.bf16.mxu0 %v3513_v16 }
 0x28d   : > { %2752 = vmatpush3.bf16.msra.mxu0 %v3063_v48 }
 0x28e   : > { %2763 = vmatprep.subr.bf16.mxu0 %v3513_v16 }
 0x290   : > { %2754 = vmatmul.mubr.msk.bf16.vlgmr.msra.gmra.mrb[4].mxu0 %vm653_vm0, %v708_v43 }
 0x291   : > { %2765 = vmatprep.mubr.msk.bf16.mxu0 %vm3514_vm1, %v3513_v16 }
 0x357   : > { %v832_v50 = vpop.f32.mrb[0].mxu1 }
 0x358   : > { %v833_v51 = vadd.f32 %v2597_v49, %v832_v50  ;;  %v2747_v52 = vpop.f32.mrb[1].mxu1 }
 0x359   : > { %v835_v53 = vpop.f32.mrb[2].mxu1 }
 0x35a   : > { %v902_v55 = vpack.c.bf16 %v833_v51, %v833_v51  ;;  %v2748_v56 = vpop.f32.mrb[3].mxu1 }
 0x35b   : > { %v767_v57 = vpop.f32.mrb[0].mxu0 }
 0x35c   : > { %v768_v58 = vadd.f32 %v2589_v54, %v767_v57  ;;  %1015 = vrot.lane.b32.xlu0 %v902_v55, %s3515_s12  ;;  %v2739_v59 = vpop.f32.mrb[1].mxu0  ;;  %v909_v60 = vsel %vm904_vm6, %v902_v55, 0 }
 0x35d   : > { %v770_v61 = vpop.f32.mrb[2].mxu0  ;;  %2758 = vmatpush3.bf16.xpose.msra.mxu1 %v909_v60 }
 0x35e   : > { %v900_v62 = vmul.f32 0.35355338, %v768_v58  ;;  %v2740_v63 = vpop.f32.mrb[3].mxu0  ;;  %2769 = vmatprep.subr.bf16.mxu1 %v3513_v16 }
 0x360   : > { %v901_v0 = vpack.c.bf16 %v900_v62, %v900_v62  ;;  %1248 = vrot.lane.b32.xlu0 %v902_v55, %s3516_s7 }
 0x362   : > { %1012 = vrot.lane.b32.xlu1 %v901_v0, %s3515_s12 }
 0x363   : > { %v894_v3 = vpop.f32.mrb[4].mxu0 }
 0x364   : > { %v895_v4 = vadd.f32 %v2605_v2, %v894_v3  ;;  %v2755_v5 = vpop.f32.mrb[5].mxu0  ;;  %2760 = vmatmul.mubr.msk.bf16.vlgmr.msra.gmra.mrb[4].mxu1 %vm904_vm6, %v901_v0 }
 0x365   : > { %v897_v6 = vpop.f32.mrb[6].mxu0  ;;  %2771 = vmatprep.mubr.msk.bf16.mxu1 %vm3514_vm1, %v3513_v16 }
 0x366   : > { %v4024_v7 = vpack.c.bf16 %v895_v4, %v895_v4  ;;  %1132 = vrot.lane.b32.xlu1 %v902_v55, %s3517_s21  ;;  %v2756_v8 = vpop.f32.mrb[7].mxu0 }
 0x368   : > { %v968_v9 = vsel %vm966_vm7, %v4024_v7, 0 }
 0x369   : > { %2764 = vmatpush3.bf16.msra.mxu0 %v968_v9 }
 0x36a   : > { %1130 = vrot.lane.b32.xlu1 %v901_v0, %s3517_s21  ;;  %2775 = vmatprep.subr.bf16.mxu0 %v3513_v16 }
 0x36e   : > { %1246 = vrot.lane.b32.xlu1 %v901_v0, %s3516_s7 }
 0x3ce   : > { %v1016_v10 = vpop.permute.xlu0 %1015 }
 0x3cf   : > { %v1021_v11 = vsel %vm904_vm6, %v1016_v10, 0 }
 0x3d0   : > { %2770 = vmatpush3.bf16.xpose.msra.mxu1 %v1021_v11 }
 0x3d1   : > { %2781 = vmatprep.subr.bf16.mxu1 %v3513_v16 }
 0x3d2   : > { %v1249_v15 = vpop.permute.xlu0 %1248 }
 0x3d3   : > { %v1254_v18 = vsel %vm904_vm6, %v1249_v15, 0 }
 0x3d4   : > { %v1013_v12 = vpop.permute.xlu1 %1012 }
 0x3d7   : > { %2772 = vmatmul.mubr.msk.bf16.vlgmr.msra.gmra.mrb[8].mxu1 %vm904_vm6, %v1013_v12 }
 0x3d8   : > { %v1133_v13 = vpop.permute.xlu1 %1132  ;;  %2783 = vmatprep.mubr.msk.bf16.mxu1 %vm3514_vm1, %v3513_v16 }
 0x3d9   : > { %v1138_v14 = vsel %vm904_vm6, %v1133_v13, 0 }
 0x3da   : > { %2782 = vmatpush3.bf16.xpose.msra.mxu1 %v1138_v14 }
 0x3db   : > { %2793 = vmatprep.subr.bf16.mxu1 %v3513_v16 }
 0x3dc   : > { %v1131_v17 = vpop.permute.xlu1 %1130 }
 0x3e0   : > { %v1247_v19 = vpop.permute.xlu1 %1246 }
 0x3e1   : > { %2784 = vmatmul.mubr.msk.bf16.vlgmr.msra.gmra.mrb[12].mxu1 %vm904_vm6, %v1131_v17 }
 0x3e2   : > { %2794 = vmatpush3.bf16.xpose.msra.mxu1 %v1254_v18  ;;  %2795 = vmatprep.mubr.msk.bf16.mxu1 %vm3514_vm1, %v3513_v16 }
 0x3e3   : > { %2805 = vmatprep.subr.bf16.mxu1 %v3513_v16 }
 0x3e9   : > { %2796 = vmatmul.mubr.msk.bf16.vlgmr.msra.gmra.mrb[16].mxu1 %vm904_vm6, %v1247_v19 }
 0x3ea   : > { %2809 = vmatprep.mubr.msk.bf16.mxu1 %vm3514_vm1, %v3513_v16 }
 0x437   : > { %v945_v25 = vpop.f32.mrb[4].mxu1 }
 0x438   : > { %v946_v26 = vadd.f32 %v945_v25, %v646_v24  ;;  %v2761_v27 = vpop.f32.mrb[5].mxu1 }
 0x439   : > { %v948_v28 = vpop.f32.mrb[6].mxu1 }
 0x43a   : > { %v2762_v29 = vpop.f32.mrb[7].mxu1  ;;  %v951_v30 = vsel %vm904_vm6, %v946_v26, -inf }
 0x43b   : > { %952 = vmax.xlane.f32.xlu0 %v951_v30 }
 0x4aa   : > { %v1057_v31 = vpop.f32.mrb[8].mxu1 }
 0x4ab   : > { %v1058_v32 = vadd.f32 %v1057_v31, %v646_v24  ;;  %v2773_v33 = vpop.f32.mrb[9].mxu1 }
 0x4ac   : > { %v1060_v34 = vpop.f32.mrb[10].mxu1 }
 0x4ad   : > { %v2774_v35 = vpop.f32.mrb[11].mxu1  ;;  %v1063_v36 = vsel %vm904_vm6, %v1058_v32, -inf }
 0x4ae   : > { %1064 = vmax.xlane.f32.xlu1 %v1063_v36 }
 0x4b4   : > { %v1174_v37 = vpop.f32.mrb[12].mxu1 }
 0x4b5   : > { %v1175_v38 = vadd.f32 %v1174_v37, %v646_v24  ;;  %v2785_v39 = vpop.f32.mrb[13].mxu1 }
 0x4b6   : > { %v1177_v40 = vpop.f32.mrb[14].mxu1 }
 0x4b7   : > { %v2786_v41 = vpop.f32.mrb[15].mxu1  ;;  %v1180_v42 = vsel %vm904_vm6, %v1175_v38, -inf }
 0x4b8   : > { %1181 = vmax.xlane.f32.xlu0 %v1180_v42 }
 0x4bc   : > { %v1290_v43 = vpop.f32.mrb[16].mxu1 }
 0x4bd   : > { %v1291_v44 = vadd.f32 %v1290_v43, %v646_v24  ;;  %v2797_v45 = vpop.f32.mrb[17].mxu1  ;;  %v3064_v43 = vld [vmem:[%s4377_s4 + $0x30] sm:$0xff]  }
 0x4be   : > { %v1293_v46 = vpop.f32.mrb[18].mxu1  ;;  %2806 = vmatpush3.bf16.msra.mxu1 %v3064_v43 }
 0x4bf   : > { %v2798_v47 = vpop.f32.mrb[19].mxu1  ;;  %v1296_v48 = vsel %vm904_vm6, %v1291_v44, -inf  ;;  %2807 = vmatprep.subr.bf16.mxu1 %v3513_v16 }
 0x4c0   : > { %1297 = vmax.xlane.f32.xlu0 %v1296_v48 }
 0x4c8   : > { %v953_v49 = vpop.xlane.xlu0 %952 }
 0x4c9   : > { %v954_v50 = vsub.f32 %v946_v26, %v953_v49 }
 0x4cb   : > { %v955_v51 = vmul.f32 1.442695, %v954_v50 }
 0x4cd   : > { %3089 = vpow2.f32 %v955_v51 }
 0x4d7   : > { %v3090_v52 = vpop.eup %3089 }
 0x4d8   : > { %v957_v53 = vsel %vm904_vm6, %v3090_v52, 0.0 }
 0x4d9   : > { %958 = vadd.xlane.f32.xlu0 %v957_v53 }
 0x53b   : > { %v1065_v54 = vpop.xlane.xlu1 %1064 }
 0x53c   : > { %v1066_v55 = vsub.f32 %v1058_v32, %v1065_v54  ;;  %v2621_v54 = vld [vmem:[#allocation14 + $0x3] ss:$0 sm:$0xff] }
 0x53e   : > { %v1067_v56 = vmul.f32 1.442695, %v1066_v55 }
 0x540   : > { %3091 = vpow2.f32 %v1067_v56 }
 0x545   : > { %v1182_v57 = vpop.xlane.xlu0 %1181 }
 0x546   : > { %v1183_v58 = vsub.f32 %v1175_v38, %v1182_v57 }
 0x548   : > { %v1184_v59 = vmul.f32 1.442695, %v1183_v58 }
 0x54a   : > { %v3092_v60 = vpop.eup %3091  ;;  %3093 = vpow2.f32 %v1184_v59 }
 0x54b   : > { %v1069_v61 = vsel %vm904_vm6, %v3092_v60, 0.0 }
 0x54c   : > { %1070 = vadd.xlane.f32.xlu1 %v1069_v61 }
 0x54d   : > { %v1298_v0 = vpop.xlane.xlu0 %1297 }
 0x54e   : > { %v1299_v3 = vsub.f32 %v1291_v44, %v1298_v0  ;;  %v3065_v44 = vld [vmem:[%s4377_s4 + $0x38] sm:$0xff]  }
 0x54f   : > { %2808 = vmatpush3.bf16.msra.mxu1 %v3065_v44 }
 0x550   : > { %v1300_v4 = vmul.f32 1.442695, %v1299_v3  ;;  %2821 = vmatprep.subr.bf16.mxu1 %v3513_v16 }
 0x554   : > { %v3094_v62 = vpop.eup %3093 }
 0x555   : > { %v1186_v63 = vsel %vm904_vm6, %v3094_v62, 0.0 }
 0x556   : > { %1187 = vadd.xlane.f32.xlu0 %v1186_v63 }
 0x55d   : > { %1192 = vrot.lane.b32.xlu1 %v4024_v7, %s3517_s21 }
 0x566   : > { %v959_v2 = vpop.xlane.xlu0 %958 }
 0x567   : > { %3095 = vrcp.f32 %v959_v2 }
 0x568   : > { %3097 = vpow2.f32 %v1300_v4  ;;  %v3066_v4 = vld [vmem:[#allocation16 + $0x10] sm:$0xff]  }
 0x56c   : > { %1076 = vrot.lane.b32.xlu0 %v4024_v7, %s3515_s12 }
 0x571   : > { %v3096_v5 = vpop.eup %3095 }
 0x572   : > { %v961_v6 = vmul.f32 %v3096_v5, %v3090_v52  ;;  %v3098_v9 = vpop.eup %3097  ;;  %v3067_v5 = vld [vmem:[#allocation16 + $0x18] sm:$0xff]  }
 0x573   : > { %v1302_v10 = vsel %vm904_vm6, %v3098_v9, 0.0 }
 0x574   : > { %v962_v8 = vpack.c.bf16 %v961_v6, %v961_v6  ;;  %v3069_v6 = vld [vmem:[#allocation16] sm:$0xff]  }
 0x576   : > { %2766 = vmatmul.mubr.msk.bf16.vlgmr.msra.gmra.mrb[8].mxu0 %vm904_vm6, %v962_v8  ;;  %v3070_v8 = vld [vmem:[#allocation16 + $0x8] sm:$0xff]  }
 0x577   : > { %2777 = vmatprep.mubr.msk.bf16.mxu0 %vm3514_vm1, %v3513_v16 }
 0x581   : > { %1303 = vadd.xlane.f32.xlu1 %v1302_v10 }
 0x592   : > { %1308 = vrot.lane.b32.xlu1 %v4024_v7, %s3516_s7 }
 0x5d9   : > { %v1071_v11 = vpop.xlane.xlu1 %1070 }
 0x5da   : > { %3099 = vrcp.f32 %v1071_v11 }
 0x5dd   : > { %v1193_v18 = vpop.permute.xlu1 %1192 }
 0x5de   : > { %v1198_v20 = vsel %vm966_vm7, %v1193_v18, 0  ;;  %v2625_v18 = vld [vmem:[#allocation11 + $0x1] ss:$0 sm:$0xff] }
 0x5e3   : > { %v1188_v12 = vpop.xlane.xlu0 %1187 }
 0x5e4   : > { %v3100_v13 = vpop.eup %3099  ;;  %3101 = vrcp.f32 %v1188_v12 }
 0x5e5   : > { %v1073_v14 = vmul.f32 %v3100_v13, %v3092_v60 }
 0x5e7   : > { %v1077_v15 = vpop.permute.xlu0 %1076  ;;  %v1074_v19 = vpack.c.bf16 %v1073_v14, %v1073_v14 }
 0x5e8   : > { %v1082_v17 = vsel %vm966_vm7, %v1077_v15, 0 }
 0x5e9   : > { %2776 = vmatpush3.bf16.msra.mxu0 %v1082_v17 }
 0x5ea   : > { %2787 = vmatprep.subr.bf16.mxu0 %v3513_v16 }
 0x5ec   : > { %2778 = vmatmul.mubr.msk.bf16.vlgmr.msra.gmra.mrb[12].mxu0 %vm904_vm6, %v1074_v19 }
 0x5ed   : > { %2788 = vmatpush3.bf16.msra.mxu0 %v1198_v20  ;;  %2789 = vmatprep.mubr.msk.bf16.mxu0 %vm3514_vm1, %v3513_v16 }
 0x5ee   : > { %v3102_v7 = vpop.eup %3101  ;;  %2799 = vmatprep.subr.bf16.mxu0 %v3513_v16 }
 0x5ef   : > { %v1190_v21 = vmul.f32 %v3102_v7, %v3094_v62  ;;  %v2626_v7 = vld [vmem:[#allocation13 + $0x1] ss:$0 sm:$0xff] }
 0x5f1   : > { %v1191_v24 = vpack.c.bf16 %v1190_v21, %v1190_v21 }
 0x5f4   : > { %2790 = vmatmul.mubr.msk.bf16.vlgmr.msra.gmra.mrb[16].mxu0 %vm904_vm6, %v1191_v24 }
 0x5f5   : > { %2801 = vmatprep.mubr.msk.bf16.mxu0 %vm3514_vm1, %v3513_v16 }
 0x60e   : > { %v1304_v25 = vpop.xlane.xlu1 %1303 }
 0x60f   : > { %3103 = vrcp.f32 %v1304_v25 }
 0x612   : > { %v1309_v26 = vpop.permute.xlu1 %1308 }
 0x613   : > { %v1314_v27 = vsel %vm966_vm7, %v1309_v26, 0  ;;  %v2631_v26 = vld [vmem:[#allocation17 + $0x1] ss:$0 sm:$0xff] }
 0x614   : > { %2800 = vmatpush3.bf16.msra.mxu0 %v1314_v27 }
 0x615   : > { %2813 = vmatprep.subr.bf16.mxu0 %v3513_v16 }
 0x619   : > { %v3104_v28 = vpop.eup %3103 }
 0x61a   : > { %v1306_v29 = vmul.f32 %v3104_v28, %v3098_v9 }
 0x61c   : > { %v1307_v30 = vpack.c.bf16 %v1306_v29, %v1306_v29 }
 0x61e   : > { %2802 = vmatmul.mubr.msk.bf16.vlgmr.msra.gmra.mrb[20].mxu0 %vm904_vm6, %v1307_v30 }
 0x61f   : > { %2817 = vmatprep.mubr.msk.bf16.mxu0 %vm3514_vm1, %v3513_v16  ;;  %2814 = vmatpush3.bf16.msra.mxu0 %v3069_v6 }
 0x620   : > { %2815 = vmatprep.subr.bf16.mxu0 %v3513_v16 }
 0x623   : > { %2816 = vmatpush3.bf16.msra.mxu0 %v3070_v8 }
 0x624   : > { %2829 = vmatprep.subr.bf16.mxu0 %v3513_v16 }
 0x649   : > { %v1004_v31 = vpop.f32.mrb[8].mxu0 }
 0x64a   : > { %1010 = vst.msk [vmem:[#allocation2] sm:$0xff] %vm904_vm6, %v1004_v31  ;;  %v2767_v32 = vpop.f32.mrb[9].mxu0 }
 0x64b   : > { %v1007_v33 = vpop.f32.mrb[10].mxu0 }
 0x64c   : > { %v2768_v34 = vpop.f32.mrb[11].mxu0 }
 0x6bf   : > { %v1118_v35 = vpop.f32.mrb[12].mxu0 }
 0x6c0   : > { %1125 = vrot.lane.b32.xlu1 %v1118_v35, %s3519_s20  ;;  %v2779_v36 = vpop.f32.mrb[13].mxu0  ;;  %v2627_v35 = vld [vmem:[#allocation17] ss:$0 sm:$0xff] }
 0x6c1   : > { %v1121_v37 = vpop.f32.mrb[14].mxu0 }
 0x6c2   : > { %v2780_v38 = vpop.f32.mrb[15].mxu0 }
 0x6c7   : > { %v1234_v39 = vpop.f32.mrb[16].mxu0 }
 0x6c8   : > { %1241 = vrot.lane.b32.xlu0 %v1234_v39, %s3520_s25  ;;  %v2791_v40 = vpop.f32.mrb[17].mxu0 }
 0x6c9   : > { %v1237_v41 = vpop.f32.mrb[18].mxu0 }
 0x6ca   : > { %v2792_v42 = vpop.f32.mrb[19].mxu0 }
 0x6f1   : > { %v1350_v45 = vpop.f32.mrb[20].mxu0 }
 0x6f2   : > { %1357 = vrot.lane.b32.xlu1 %v1350_v45, %s3521_s6  ;;  %v2803_v46 = vpop.f32.mrb[21].mxu0  ;;  %v3071_v45 = vld [vmem:[#allocation16 + $0x20] sm:$0xff]  }
 0x6f3   : > { %v1353_v47 = vpop.f32.mrb[22].mxu0  ;;  %v3072_v46 = vld [vmem:[#allocation16 + $0x28] sm:$0xff]  }
 0x6f4   : > { %v2804_v48 = vpop.f32.mrb[23].mxu0 }
 0x732   : > { %v1126_v49 = vpop.permute.xlu1 %1125 }
 0x733   : > { %1129 = vst.msk [vmem:[#allocation2] sm:$0xff] %vm1128_vm9, %v1126_v49 }
 0x73a   : > { %v1242_v50 = vpop.permute.xlu0 %1241 }
 0x73b   : > { %1245 = vst.msk [vmem:[#allocation2] sm:$0xff] %vm1244_vm10, %v1242_v50 }
 0x764   : > { %v1358_v51 = vpop.permute.xlu1 %1357 }
 0x765   : > { %1361 = vst.msk [vmem:[#allocation2] sm:$0xff] %vm1360_vm11, %v1358_v51 }
 0x76c   : > { %v1362_v52 = vld [vmem:[#allocation2] sm:$0xff] }
 0x76d   : > { %v1363_v53 = vpack.c.bf16 %v1362_v52, %v1362_v52 }
 0x76f   : > { %2810 = vmatmul.mubr.msk.bf16.vlgmr.msra.gmra.mrb[20].mxu1 %vm653_vm0, %v1363_v53 }
 0x770   : > { %2825 = vmatprep.mubr.msk.bf16.mxu1 %vm3514_vm1, %v3513_v16  ;;  %2822 = vmatpush3.bf16.msra.mxu1 %v3066_v4 }
 0x771   : > { %2823 = vmatprep.subr.bf16.mxu1 %v3513_v16 }
 0x774   : > { %2824 = vmatpush3.bf16.msra.mxu1 %v3067_v5 }
 0x775   : > { %2837 = vmatprep.subr.bf16.mxu1 %v3513_v16 }
 0x842   : > { %v1423_v55 = vpop.f32.mrb[20].mxu1 }
 0x843   : > { %v1424_v56 = vadd.f32 %v2621_v54, %v1423_v55  ;;  %v2811_v57 = vpop.f32.mrb[21].mxu1 }
 0x844   : > { %v1426_v58 = vpop.f32.mrb[22].mxu1 }
 0x845   : > { %v4102_v59 = vadd.f32 %v1424_v56, %v3969_v1  ;;  %v2812_v60 = vpop.f32.mrb[23].mxu1  ;;  %v4111_v1 = vld [vmem:[%s556_s2] sm:$0xff]   ;;  %s4378_s2 = sld [smem:[#allocation29_spill]] }
 0x846   : > { %2826 = vmatmul.mubr.msk.bf16.vlgmr.msra.gmra.mrb[24].mxu1 %vm653_vm0, %v4111_v1 }
 0x847   : > { %v1432_v61 = vsel %vm653_vm0, %v4102_v59, 0.0  ;;  %2839 = vmatprep.mubr.msk.bf16.mxu1 %vm3514_vm1, %v3513_v16 }
 0x848   : > { %1433 = vadd.xlane.f32.xlu0 %v1432_v61 }
 0x84b   : > { %s647_s26 = sld [smem:[#allocation4 + %s4378_s2]]  ;;  %s2665_s24 = sshll.u32 %s4378_s2, 7 }
 0x84c   : > { %s4233_s5 = scalar_lea.hbm %s4383_s0, %s2665_s24  ;;  %s3399_s2 = scalar_lea.vmem %s4235_s17, 128 }
 0x84d   : > { %p3400_p2 = scmp.ne.s32.totalorder %s4235_s17, %s3399_s2  ;;  %p3407_p10 = scmp.lt.s32.totalorder %s3405_s30, %s3399_s2 }
 0x84f   : > { %p3401_p0 = pnand %p3400_p2, %p4385_p7  ;;  %p3408_p6 = por %p3407_p10, %p3406_p5 }
 0x851   : > { %v648_v54 = vstv %s647_s26  ;;  %p3402_p12 = pneg %p3401_p0 }
 0x852   : > { %vm649_vm14 = vcmp.lt.s32.totalorder %v4047_v22, %v648_v54 }
 0x853   : > { %v650_v55 = vsel %vm649_vm14, 0.0, %v3518_v23  ;;  %p3409_p1 = pnand %p3408_p6, %p3402_p12 }
 0x8d5   : > { %v1434_v62 = vpop.xlane.xlu0 %1433 }
 0x8d6   : > { %v1435_v63 = vmul.f32 0.03125, %v1434_v62 }
 0x8d8   : > { %v1436_v0 = vsub.f32 %v4102_v59, %v1435_v63 }
 0x8da   : > { %v1437_v2 = vmul.f32 %v1436_v0, %v1436_v0  ;;  %v1455_v19 = vmul.f32 %v2625_v18, %v1436_v0 }
 0x8dc   : > { %v1438_v3 = vsel %vm653_vm0, %v1437_v2, 0.0 }
 0x8dd   : > { %1439 = vadd.xlane.f32.xlu1 %v1438_v3 }
 0x919   : > { %v1591_v27 = vpop.f32.mrb[24].mxu1 }
 0x91a   : > { %v1592_v28 = vadd.f32 %v2631_v26, %v1591_v27  ;;  %v2827_v29 = vpop.f32.mrb[25].mxu1 }
 0x91b   : > { %v1594_v30 = vpop.f32.mrb[26].mxu1 }
 0x91c   : > { %v1595_v31 = vadd.f32 %v2631_v26, %v1594_v30  ;;  %v2828_v32 = vpop.f32.mrb[27].mxu1 }
 0x91e   : > { %v1663_v33 = vpack.c.bf16 %v1595_v31, %v1592_v28 }
 0x920   : > { %1772 = vrot.lane.b32.xlu0 %v1663_v33, %s3515_s12  ;;  %v1669_v34 = vsel %vm904_vm6, %v1663_v33, 0 }
 0x921   : > { %2838 = vmatpush3.bf16.xpose.msra.mxu1 %v1669_v34 }
 0x922   : > { %2849 = vmatprep.subr.bf16.mxu1 %v3513_v16 }
 0x924   : > { %1886 = vrot.lane.b32.xlu0 %v1663_v33, %s3517_s21 }
 0x928   : > { %1999 = vrot.lane.b32.xlu0 %v1663_v33, %s3516_s7 }
 0x96a   : > { %v1440_v9 = vpop.xlane.xlu1 %1439 }
 0x96b   : > { %v1441_v10 = vmul.f32 0.032258064, %v1440_v9 }
 0x96d   : > { %3105 = vrsqrt.f32 %v1441_v10  ;;  %vm1444_vm12 = vcmp.eq.f32.partialorder %v1441_v10, inf  ;;  %v1447_v13 = vand.u32 2147483648, %v1441_v10  ;;  %vm1446_vm13 = vcmp.eq.f32.partialorder %v1441_v10, 0.0 }
 0x977   : > { %v3106_v11 = vpop.eup %3105 }
 0x978   : > { %v1443_v12 = vmul.f32 %v3106_v11, %v1441_v10 }
 0x97a   : > { %v1445_v14 = vsel %vm1444_vm12, %v1441_v10, %v1443_v12 }
 0x97b   : > { %v1448_v15 = vsel %vm1446_vm13, %v1447_v13, %v1445_v14 }
 0x97c   : > { %v1449_v17 = vadd.f32 1e-06, %v1448_v15 }
 0x97e   : > { %3107 = vrcp.f32 %v1449_v17 }
 0x988   : > { %v3108_v20 = vpop.eup %3107 }
 0x989   : > { %v1456_v21 = vmul.f32 %v3108_v20, %v1455_v19  ;;  %v2636_v20 = vld [vmem:[#allocation17 + $0x2] ss:$0 sm:$0xff] }
 0x98b   : > { %v1461_v24 = vadd.f32 %v2626_v7, %v1456_v21 }
 0x98d   : > { %v1462_v25 = vpack.c.bf16 %v1461_v24, %v1461_v24 }
 0x98f   : > { %2818 = vmatmul.mubr.msk.bf16.vlgmr.msra.gmra.mrb[24].mxu0 %vm653_vm0, %v1462_v25 }
 0x990   : > { %2833 = vmatprep.mubr.msk.bf16.mxu0 %vm3514_vm1, %v3513_v16  ;;  %2830 = vmatpush3.bf16.msra.mxu0 %v3071_v45 }
 0x991   : > { %2831 = vmatprep.subr.bf16.mxu0 %v3513_v16 }
 0x992   : > { %v1773_v42 = vpop.permute.xlu0 %1772 }
 0x993   : > { %v1778_v44 = vsel %vm904_vm6, %v1773_v42, 0 }
 0x994   : > { %2832 = vmatpush3.bf16.msra.mxu0 %v3072_v46 }
 0x995   : > { %2843 = vmatprep.subr.bf16.mxu0 %v3513_v16 }
 0x996   : > { %v1887_v47 = vpop.permute.xlu0 %1886 }
 0x997   : > { %2834 = vmatmul.mubr.msk.bf16.vlgmr.msra.gmra.mrb[28].mxu0 %vm653_vm0, %v4111_v1  ;;  %v1892_v49 = vsel %vm904_vm6, %v1887_v47, 0 }
 0x998   : > { %2845 = vmatprep.mubr.msk.bf16.mxu0 %vm3514_vm1, %v3513_v16 }
 0x99a   : > { %v2000_v50 = vpop.permute.xlu0 %1999 }
 0x99b   : > { %v2005_v52 = vsel %vm904_vm6, %v2000_v50, 0 }
 0xa62   : > { %v1521_v36 = vpop.f32.mrb[24].mxu0 }
 0xa63   : > { %v1522_v37 = vadd.f32 %v2627_v35, %v1521_v36  ;;  %v2819_v38 = vpop.f32.mrb[25].mxu0 }
 0xa64   : > { %v1524_v39 = vpop.f32.mrb[26].mxu0 }
 0xa65   : > { %v1661_v40 = vmul.f32 0.35355338, %v1522_v37  ;;  %v2820_v41 = vpop.f32.mrb[27].mxu0 }
 0xa67   : > { %v1662_v43 = vpack.c.bf16 %v1661_v40, %v1661_v40 }
 0xa69   : > { %1769 = vrot.lane.b32.xlu1 %v1662_v43, %s3515_s12  ;;  %2840 = vmatmul.mubr.msk.bf16.vlgmr.msra.gmra.mrb[28].mxu1 %vm904_vm6, %v1662_v43 }
 0xa6a   : > { %2850 = vmatpush3.bf16.xpose.msra.mxu1 %v1778_v44  ;;  %2851 = vmatprep.mubr.msk.bf16.mxu1 %vm3514_vm1, %v3513_v16  ;;  %v1654_v7 = vpop.f32.mrb[28].mxu0 }
 0xa6b   : > { %2861 = vmatprep.subr.bf16.mxu1 %v3513_v16  ;;  %v1655_v21 = vadd.f32 %v2636_v20, %v1654_v7  ;;  %v2835_v24 = vpop.f32.mrb[29].mxu0 }
 0xa6c   : > { %v1657_v25 = vpop.f32.mrb[30].mxu0 }
 0xa6d   : > { %1884 = vrot.lane.b32.xlu1 %v1662_v43, %s3517_s21  ;;  %v1658_v27 = vadd.f32 %v2636_v20, %v1657_v25  ;;  %v2836_v28 = vpop.f32.mrb[31].mxu0 }
 0xa6f   : > { %v1664_v30 = vpack.c.bf16 %v1658_v27, %v1655_v21 }
 0xa71   : > { %1997 = vrot.lane.b32.xlu1 %v1662_v43, %s3516_s7  ;;  %2844 = vmatpush3.bf16.msra.mxu0 %v1664_v30 }
 0xa72   : > { %2855 = vmatprep.subr.bf16.mxu0 %v3513_v16 }
 0xadb   : > { %v1770_v48 = vpop.permute.xlu1 %1769 }
 0xadc   : > { %2852 = vmatmul.mubr.msk.bf16.vlgmr.msra.gmra.mrb[32].mxu1 %vm904_vm6, %v1770_v48 }
 0xadd   : > { %2862 = vmatpush3.bf16.xpose.msra.mxu1 %v1892_v49  ;;  %2863 = vmatprep.mubr.msk.bf16.mxu1 %vm3514_vm1, %v3513_v16 }
 0xade   : > { %2873 = vmatprep.subr.bf16.mxu1 %v3513_v16 }
 0xadf   : > { %v1885_v51 = vpop.permute.xlu1 %1884 }
 0xae3   : > { %v1998_v53 = vpop.permute.xlu1 %1997 }
 0xae4   : > { %2864 = vmatmul.mubr.msk.bf16.vlgmr.msra.gmra.mrb[36].mxu1 %vm904_vm6, %v1885_v51 }
 0xae5   : > { %2874 = vmatpush3.bf16.xpose.msra.mxu1 %v2005_v52  ;;  %2875 = vmatprep.mubr.msk.bf16.mxu1 %vm3514_vm1, %v3513_v16 }
 0xae6   : > { %2885 = vmatprep.subr.bf16.mxu1 %v3513_v16 }
 0xaec   : > { %2876 = vmatmul.mubr.msk.bf16.vlgmr.msra.gmra.mrb[40].mxu1 %vm904_vm6, %v1998_v53 }
 0xaed   : > { %2889 = vmatprep.mubr.msk.bf16.mxu1 %vm3514_vm1, %v3513_v16 }
 0xb3c   : > { %v1705_v56 = vpop.f32.mrb[28].mxu1 }
 0xb3d   : > { %v1706_v57 = vadd.f32 %v1705_v56, %v650_v55  ;;  %v2841_v58 = vpop.f32.mrb[29].mxu1 }
 0xb3e   : > { %v1708_v60 = vpop.f32.mrb[30].mxu1 }
 0xb3f   : > { %v2842_v61 = vpop.f32.mrb[31].mxu1  ;;  %v1712_v62 = vsel %vm1711_vm15, %v1706_v57, -inf }
 0xb40   : > { %1713 = vmax.xlane.f32.xlu0 %v1712_v62 }
 0xbaf   : > { %v1814_v63 = vpop.f32.mrb[32].mxu1 }
 0xbb0   : > { %v1815_v0 = vadd.f32 %v1814_v63, %v650_v55  ;;  %v2853_v2 = vpop.f32.mrb[33].mxu1 }
 0xbb1   : > { %v1817_v3 = vpop.f32.mrb[34].mxu1 }
 0xbb2   : > { %v2854_v4 = vpop.f32.mrb[35].mxu1  ;;  %v1820_v5 = vsel %vm1711_vm15, %v1815_v0, -inf }
 0xbb3   : > { %1821 = vmax.xlane.f32.xlu1 %v1820_v5 }
 0xbb7   : > { %v1928_v22 = vpop.f32.mrb[36].mxu1 }
 0xbb8   : > { %v1929_v1 = vadd.f32 %v1928_v22, %v650_v55  ;;  %v2865_v23 = vpop.f32.mrb[37].mxu1 }
 0xbb9   : > { %v1931_v6 = vpop.f32.mrb[38].mxu1 }
 0xbba   : > { %v2866_v8 = vpop.f32.mrb[39].mxu1  ;;  %v1934_v9 = vsel %vm1711_vm15, %v1929_v1, -inf }
 0xbbb   : > { %1935 = vmax.xlane.f32.xlu0 %v1934_v9 }
 0xbbf   : > { %v2041_v10 = vpop.f32.mrb[40].mxu1 }
 0xbc0   : > { %v2042_v11 = vadd.f32 %v2041_v10, %v650_v55  ;;  %v2877_v12 = vpop.f32.mrb[41].mxu1 }
 0xbc1   : > { %v2044_v13 = vpop.f32.mrb[42].mxu1 }
 0xbc2   : > { %v2878_v14 = vpop.f32.mrb[43].mxu1  ;;  %v2047_v15 = vsel %vm1711_vm15, %v2042_v11, -inf  ;;  %v3073_v13 = vld [vmem:[#allocation16 + $0x30] sm:$0xff]  }
 0xbc3   : > { %2048 = vmax.xlane.f32.xlu0 %v2047_v15  ;;  %2886 = vmatpush3.bf16.msra.mxu1 %v3073_v13  ;;  %v3074_v14 = vld [vmem:[#allocation16 + $0x38] sm:$0xff]  }
 0xbc4   : > { %2887 = vmatprep.subr.bf16.mxu1 %v3513_v16 }
 0xbc7   : > { %2888 = vmatpush3.bf16.msra.mxu1 %v3074_v14 }
 0xbc8   : > { %2901 = vmatprep.subr.bf16.mxu1 %v3513_v16 }
 0xbcd   : > { %v1714_v17 = vpop.xlane.xlu0 %1713 }
 0xbce   : > { %v1715_v18 = vsub.f32 %v1706_v57, %v1714_v17 }
 0xbd0   : > { %v1716_v19 = vmul.f32 1.442695, %v1715_v18 }
 0xbd2   : > { %3109 = vpow2.f32 %v1716_v19 }
 0xbdc   : > { %v3110_v26 = vpop.eup %3109 }
 0xbdd   : > { %v1718_v29 = vsel %vm1711_vm15, %v3110_v26, 0.0 }
 0xbde   : > { %1719 = vadd.xlane.f32.xlu0 %v1718_v29 }
 0xc40   : > { %v1822_v31 = vpop.xlane.xlu1 %1821 }
 0xc41   : > { %v1823_v32 = vsub.f32 %v1815_v0, %v1822_v31 }
 0xc43   : > { %v1824_v33 = vmul.f32 1.442695, %v1823_v32 }
 0xc45   : > { %3111 = vpow2.f32 %v1824_v33 }
 0xc48   : > { %v1936_v34 = vpop.xlane.xlu0 %1935 }
 0xc49   : > { %v1937_v35 = vsub.f32 %v1929_v1, %v1936_v34 }
 0xc4b   : > { %v1938_v36 = vmul.f32 1.442695, %v1937_v35 }
 0xc4d   : > { %3113 = vpow2.f32 %v1938_v36 }
 0xc4f   : > { %v3112_v37 = vpop.eup %3111 }
 0xc50   : > { %v1826_v38 = vsel %vm1711_vm15, %v3112_v37, 0.0  ;;  %v2049_v41 = vpop.xlane.xlu0 %2048 }
 0xc51   : > { %1827 = vadd.xlane.f32.xlu1 %v1826_v38  ;;  %v2050_v43 = vsub.f32 %v2042_v11, %v2049_v41  ;;  %v3078_v41 = vld [vmem:[%s4379_s23 + $0x8] sm:$0xff]  }
 0xc53   : > { %v2051_v44 = vmul.f32 1.442695, %v2050_v43 }
 0xc57   : > { %v3114_v39 = vpop.eup %3113 }
 0xc58   : > { %v1940_v40 = vsel %vm1711_vm15, %v3114_v39, 0.0 }
 0xc59   : > { %1941 = vadd.xlane.f32.xlu0 %v1940_v40  ;;  %v3076_v40 = vld [vmem:[#allocation19 + $0x8] sm:$0xff]  }
 0xc62   : > { %1946 = vrot.lane.b32.xlu1 %v1664_v30, %s3517_s21 }
 0xc6b   : > { %v1720_v42 = vpop.xlane.xlu0 %1719 }
 0xc6c   : > { %3115 = vrcp.f32 %v1720_v42 }
 0xc6d   : > { %3117 = vpow2.f32 %v2051_v44 }
 0xc6f   : > { %1833 = vrot.lane.b32.xlu0 %v1664_v30, %s3515_s12 }
 0xc76   : > { %v3116_v45 = vpop.eup %3115 }
 0xc77   : > { %v1722_v46 = vmul.f32 %v3116_v45, %v3110_v26  ;;  %v3118_v48 = vpop.eup %3117  ;;  %v2648_v26 = vld [vmem:[#allocation17 + $0x3] ss:$0 sm:$0xff] }
 0xc78   : > { %v2053_v49 = vsel %vm1711_vm15, %v3118_v48, 0.0 }
 0xc79   : > { %v1723_v47 = vpack.c.bf16 %v1722_v46, %v1722_v46 }
 0xc7b   : > { %2846 = vmatmul.mubr.msk.bf16.vlgmr.msra.gmra.mrb[32].mxu0 %vm1711_vm15, %v1723_v47 }
 0xc7c   : > { %2857 = vmatprep.mubr.msk.bf16.mxu0 %vm3514_vm1, %v3513_v16 }
 0xc86   : > { %2054 = vadd.xlane.f32.xlu1 %v2053_v49 }
 0xc97   : > { %2059 = vrot.lane.b32.xlu1 %v1664_v30, %s3516_s7  ;;  %s4380_s7 = sld [smem:[#allocation44_spill]] }
 0xcde   : > { %v1828_v50 = vpop.xlane.xlu1 %1827 }
 0xcdf   : > { %3119 = vrcp.f32 %v1828_v50  ;;  %v2652_v50 = vld [vmem:[#allocation11 + $0x2] ss:$0 sm:$0xff] }
 0xce2   : > { %v1947_v56 = vpop.permute.xlu1 %1946 }
 0xce6   : > { %v1942_v51 = vpop.xlane.xlu0 %1941 }
 0xce7   : > { %3121 = vrcp.f32 %v1942_v51 }
 0xce9   : > { %v3120_v52 = vpop.eup %3119 }
 0xcea   : > { %v1830_v53 = vmul.f32 %v3120_v52, %v3112_v37  ;;  %v1834_v54 = vpop.permute.xlu0 %1833 }
 0xceb   : > { %2856 = vmatpush3.bf16.msra.mxu0 %v1834_v54 }
 0xcec   : > { %v1831_v55 = vpack.c.bf16 %v1830_v53, %v1830_v53  ;;  %2867 = vmatprep.subr.bf16.mxu0 %v3513_v16  ;;  %v2653_v53 = vld [vmem:[#allocation13 + $0x2] ss:$0 sm:$0xff] }
 0xcee   : > { %2858 = vmatmul.mubr.msk.bf16.vlgmr.msra.gmra.mrb[36].mxu0 %vm1711_vm15, %v1831_v55 }
 0xcef   : > { %2868 = vmatpush3.bf16.msra.mxu0 %v1947_v56  ;;  %2869 = vmatprep.mubr.msk.bf16.mxu0 %vm3514_vm1, %v3513_v16 }
 0xcf0   : > { %2879 = vmatprep.subr.bf16.mxu0 %v3513_v16 }
 0xcf1   : > { %v3122_v57 = vpop.eup %3121 }
 0xcf2   : > { %v1944_v58 = vmul.f32 %v3122_v57, %v3114_v39  ;;  %v3075_v39 = vld [vmem:[#allocation19] sm:$0xff]   ;;  %v3079_v57 = vld [vmem:[%s4379_s23 + $0x10] sm:$0xff]  }
 0xcf4   : > { %v1945_v60 = vpack.c.bf16 %v1944_v58, %v1944_v58  ;;  %v3080_v58 = vld [vmem:[%s4379_s23 + $0x18] sm:$0xff]  }
 0xcf6   : > { %2870 = vmatmul.mubr.msk.bf16.vlgmr.msra.gmra.mrb[40].mxu0 %vm1711_vm15, %v1945_v60  ;;  %v2654_v60 = vld [vmem:[%s4380_s7] ss:$0 sm:$0xff] }
 0xcf7   : > { %2881 = vmatprep.mubr.msk.bf16.mxu0 %vm3514_vm1, %v3513_v16 }
 0xd13   : > { %v2055_v61 = vpop.xlane.xlu1 %2054 }
 0xd14   : > { %3123 = vrcp.f32 %v2055_v61 }
 0xd17   : > { %v2060_v62 = vpop.permute.xlu1 %2059 }
 0xd18   : > { %2880 = vmatpush3.bf16.msra.mxu0 %v2060_v62 }
 0xd19   : > { %2893 = vmatprep.subr.bf16.mxu0 %v3513_v16 }
 0xd1e   : > { %v3124_v63 = vpop.eup %3123 }
 0xd1f   : > { %v2057_v0 = vmul.f32 %v3124_v63, %v3118_v48 }
 0xd21   : > { %v2058_v2 = vpack.c.bf16 %v2057_v0, %v2057_v0 }
 0xd23   : > { %2882 = vmatmul.mubr.msk.bf16.vlgmr.msra.gmra.mrb[44].mxu0 %vm1711_vm15, %v2058_v2 }
 0xd24   : > { %2897 = vmatprep.mubr.msk.bf16.mxu0 %vm3514_vm1, %v3513_v16  ;;  %2894 = vmatpush3.bf16.msra.mxu0 %v3075_v39 }
 0xd25   : > { %2895 = vmatprep.subr.bf16.mxu0 %v3513_v16 }
 0xd28   : > { %2896 = vmatpush3.bf16.msra.mxu0 %v3076_v40 }
 0xd4e   : > { %v1761_v3 = vpop.f32.mrb[32].mxu0 }
 0xd4f   : > { %1767 = vst.msk [vmem:[#allocation2] sm:$0xff] %vm904_vm6, %v1761_v3  ;;  %v2847_v4 = vpop.f32.mrb[33].mxu0 }
 0xd50   : > { %v1764_v5 = vpop.f32.mrb[34].mxu0 }
 0xd51   : > { %v2848_v22 = vpop.f32.mrb[35].mxu0 }
 0xdc1   : > { %v1873_v1 = vpop.f32.mrb[36].mxu0 }
 0xdc2   : > { %1880 = vrot.lane.b32.xlu1 %v1873_v1, %s3519_s20  ;;  %v2859_v23 = vpop.f32.mrb[37].mxu0 }
 0xdc3   : > { %v1876_v6 = vpop.f32.mrb[38].mxu0 }
 0xdc4   : > { %v2860_v8 = vpop.f32.mrb[39].mxu0 }
 0xdc9   : > { %v1986_v9 = vpop.f32.mrb[40].mxu0 }
 0xdca   : > { %1993 = vrot.lane.b32.xlu0 %v1986_v9, %s3520_s25  ;;  %v2871_v10 = vpop.f32.mrb[41].mxu0  ;;  %s4381_s25 = sld [smem:[#allocation46_spill]] }
 0xdcb   : > { %v1989_v11 = vpop.f32.mrb[42].mxu0 }
 0xdcc   : > { %v2872_v12 = vpop.f32.mrb[43].mxu0 }
 0xdf6   : > { %v2099_v15 = vpop.f32.mrb[44].mxu0 }
 0xdf7   : > { %2106 = vrot.lane.b32.xlu1 %v2099_v15, %s3521_s6  ;;  %v2883_v17 = vpop.f32.mrb[45].mxu0 }
 0xdf8   : > { %v2102_v18 = vpop.f32.mrb[46].mxu0 }
 0xdf9   : > { %v2884_v19 = vpop.f32.mrb[47].mxu0 }
 0xe34   : > { %v1881_v20 = vpop.permute.xlu1 %1880 }
 0xe35   : > { %1883 = vst.msk [vmem:[#allocation2] sm:$0xff] %vm1128_vm9, %v1881_v20 }
 0xe3c   : > { %v1994_v7 = vpop.permute.xlu0 %1993 }
 0xe3d   : > { %1996 = vst.msk [vmem:[#allocation2] sm:$0xff] %vm1244_vm10, %v1994_v7 }
 0xe69   : > { %v2107_v21 = vpop.permute.xlu1 %2106 }
 0xe6a   : > { %2109 = vst.msk [vmem:[#allocation2] sm:$0xff] %vm1360_vm11, %v2107_v21 }
 0xe71   : > { %v2110_v24 = vld [vmem:[#allocation2] sm:$0xff] }
 0xe72   : > { %v2111_v25 = vpack.c.bf16 %v2110_v24, %v2110_v24 }
 0xe74   : > { %2890 = vmatmul.mubr.msk.bf16.vlgmr.msra.gmra.mrb[44].mxu1 %vm653_vm0, %v2111_v25 }
 0xe75   : > { %2909 = vmatprep.mubr.msk.bf16.mxu1 %vm3514_vm1, %v3513_v16 }
 0xf47   : > { %v2171_v27 = vpop.f32.mrb[44].mxu1 }
 0xf48   : > { %v2172_v28 = vadd.f32 %v2648_v26, %v2171_v27  ;;  %v2891_v29 = vpop.f32.mrb[45].mxu1 }
 0xf49   : > { %v2174_v30 = vpop.f32.mrb[46].mxu1 }
 0xf4a   : > { %v4198_v31 = vadd.f32 %v2172_v28, %v4102_v59  ;;  %v2892_v32 = vpop.f32.mrb[47].mxu1  ;;  %v3077_v59 = vld [vmem:[%s4379_s23] sm:$0xff]  }
 0xf4b   : > { %2902 = vmatpush3.bf16.msra.mxu1 %v3077_v59 }
 0xf4c   : > { %v2180_v33 = vsel %vm653_vm0, %v4198_v31, 0.0  ;;  %2903 = vmatprep.subr.bf16.mxu1 %v3513_v16 }
 0xf4d   : > { %2181 = vadd.xlane.f32.xlu0 %v2180_v33 }
 0xf4f   : > { %2904 = vmatpush3.bf16.msra.mxu1 %v3078_v41 }
 0xf50   : > { %2905 = vmatprep.subr.bf16.mxu1 %v3513_v16 }
 0xf53   : > { %2906 = vmatpush3.bf16.msra.mxu1 %v3079_v57 }
 0xf54   : > { %2907 = vmatprep.subr.bf16.mxu1 %v3513_v16  ;;  %v2658_v16 = vld [vmem:[%s4381_s25] ss:$0 sm:$0xff] }
 0xf57   : > { %2908 = vmatpush3.bf16.msra.mxu1 %v3080_v58 }
 0xfda   : > { %v2182_v34 = vpop.xlane.xlu0 %2181 }
 0xfdb   : > { %v2183_v35 = vmul.f32 0.03125, %v2182_v34 }
 0xfdd   : > { %v2184_v36 = vsub.f32 %v4198_v31, %v2183_v35 }
 0xfdf   : > { %v2185_v37 = vmul.f32 %v2184_v36, %v2184_v36  ;;  %v2203_v51 = vmul.f32 %v2652_v50, %v2184_v36 }
 0xfe1   : > { %v2186_v38 = vsel %vm653_vm0, %v2185_v37, 0.0 }
 0xfe2   : > { %2187 = vadd.xlane.f32.xlu1 %v2186_v38 }
0x106f   : > { %v2188_v42 = vpop.xlane.xlu1 %2187 }
0x1070   : > { %v2189_v43 = vmul.f32 0.032258064, %v2188_v42 }
0x1072   : > { %3125 = vrsqrt.f32 %v2189_v43  ;;  %vm2192_vm1 = vcmp.eq.f32.partialorder %v2189_v43, inf  ;;  %v2195_v46 = vand.u32 2147483648, %v2189_v43  ;;  %vm2194_vm2 = vcmp.eq.f32.partialorder %v2189_v43, 0.0 }
0x107c   : > { %v3126_v44 = vpop.eup %3125 }
0x107d   : > { %v2191_v45 = vmul.f32 %v3126_v44, %v2189_v43 }
0x107f   : > { %v2193_v47 = vsel %vm2192_vm1, %v2189_v43, %v2191_v45 }
0x1080   : > { %v2196_v48 = vsel %vm2194_vm2, %v2195_v46, %v2193_v47 }
0x1081   : > { %v2197_v49 = vadd.f32 1e-06, %v2196_v48 }
0x1083   : > { %3127 = vrcp.f32 %v2197_v49 }
0x108d   : > { %v3128_v52 = vpop.eup %3127 }
0x108e   : > { %v2204_v54 = vmul.f32 %v3128_v52, %v2203_v51 }
0x1090   : > { %v2209_v55 = vadd.f32 %v2653_v53, %v2204_v54 }
0x1092   : > { %v2210_v56 = vpack.c.bf16 %v2209_v55, %v2209_v55 }
0x1094   : > { %2898 = vmatmul.mubr.msk.bf16.vlgmr.msra.gmra.mrb[48].mxu0 %vm653_vm0, %v2210_v56 }
0x1167   : > { %v2271_v61 = vpop.f32.mrb[48].mxu0 }
0x1168   : > { %v2272_v62 = vadd.f32 %v2654_v60, %v2271_v61  ;;  %v2899_v63 = vpop.f32.mrb[49].mxu0 }
0x1169   : > { %v2274_v0 = vpop.f32.mrb[50].mxu0 }
0x116a   : > { %v2277_v2 = vmax.f32 %v2272_v62, 0.0  ;;  %v2900_v3 = vpop.f32.mrb[51].mxu0 }
0x116c   : > { %v2278_v4 = vpack.c.bf16 %v2277_v2, %v2277_v2 }
0x116e   : > { %2910 = vmatmul.mubr.msk.bf16.vlgmr.msra.gmra.mrb[48].mxu1 %vm2318_vm3, %v2278_v4 }
0x1241   : > { %v2356_v5 = vpop.f32.mrb[48].mxu1 }
0x1242   : > { %v2357_v22 = vadd.f32 %v2658_v16, %v2356_v5  ;;  %v2911_v1 = vpop.f32.mrb[49].mxu1 }
0x1243   : > { %v2359_v23 = vpop.f32.mrb[50].mxu1 }
0x1244   : > { %v2362_v6 = vadd.f32 %v2357_v22, %v4198_v31  ;;  %v2912_v8 = vpop.f32.mrb[51].mxu1 }
0x1246   : > { %2363 = vst.msk [vmem:[%s632_s28] sm:$0xff] %vm653_vm0, %v2362_v6 }
0x1247   : > { %3412 = shalt.err (!%p3409_p1)
}
0x1248   : > { %s3413_s13 = scalar_lea.hbm %s4233_s5, 128  ;;  %s3417_s15 = scalar_lea.hbm %s4384_s16, 256 }
0x1249   : > { %p3414_p11 = scmp.ne.s32.totalorder %s4233_s5, %s3413_s13  ;;  %p3418_p3 = scmp.lt.u32.totalorder %s4233_s5, %s4384_s16 }
0x124a   : > { %p3419_p4 = scmp.lt.u32.totalorder %s3417_s15, %s3413_s13  ;;  %p3421_p2 = scmp.lt.u32.totalorder %s3413_s13, %s4233_s5 }
0x124b   : > { %p3415_p9 = pnand %p3414_p11, %p4385_p7 }
0x124c   : > { %p3420_p13 = por %p3419_p4, %p3418_p3 }
0x124d   : > { %p3416_p8 = pneg %p3415_p9 }
0x124e   : > { %p3422_p0 = por %p3421_p2, %p3420_p13 }
0x1250   : > { %p3423_p12 = pnand %p3422_p0, %p3416_p8 }
0x1252   : > { %3426 = shalt.err (!%p3423_p12)
}
0x1253   : > { %2943 = dma.vmem_to_hbm [thread:$0]  (%p4385_p7), %s4235_s17, 128, %s4233_s5, %s2365_s22  }
0x1254 PF: > { %s4386_s21 = sld [smem:[#allocation28_spill]]  ;;  %s4387_s20 = sld [smem:[#allocation37_spill]] }
0x1255   : > { %s4388_s25 = sld [smem:[#allocation31_spill]] }
0x125a   : > { %s2391_s24 = sand.u32 1, %s4386_s21   ;;  %p4389_p5 = scmp.ne.s32.totalorder %s4387_s20, 0 }
0x125b   : > { %p4390_p10 = scmp.ge.s32.totalorder %s4388_s25, 2  ;;  %s2392_s28 = scalar_lea.sflag [#allocation7], %s2391_s24 }
0x125d   : > { %p2975_p6 = pnand %p4390_p10, %p4389_p5 }
0x125f   : > { %3474 = dma.done.wait (!%p2975_p6), %s2392_s28, 128  }
0x1260   : > { %3476 = vsyncadd (!%p2975_p6), %s2392_s28, 4294967168  ;;  %s42_s22 = sadd.s32 1, %s4388_s25   ;;  %s4391_s11 = sld [smem:[#allocation36_spill]] }
0x1261   : > { %p39_p1 = scmp.ge.s32.totalorder %s42_s22, 4   ;;  %s4392_s20 = sld [smem:[#allocation30_spill]] }
0x1262   : > { %s4393_s21 = sld [smem:[#allocation33_spill]]  ;;  %s4394_s0 = smov %s3483_s18 }
0x1263   : > { %s4395_s18 = smov %s3487_s19  ;;  %41 = sbr.rel (!%p39_p1) target bundleno = 28 (0x1c), region = 171 }
0x1266   : > { %s4396_s19 = smov %s4391_s11 }
0x126a   :  { %2397 = vsyncpa [#allocation6], 1 }
0x126b   :  { %2399 = vsyncpa [#allocation6 + $0x1], 1 }
0x126c   :  { %2400 = vsyncpa [#allocation9], 1 }
0x126d   :  { %2402 = vsyncpa [#allocation9 + $0x1], 1 }
0x126e   :  { %2403 = vsyncpa [#allocation12], 1 }
0x126f   :  { %2404 = vsyncpa [#allocation15], 1 }
0x1270   :  { %2405 = vsyncpa [#allocation18], 1 }
0x1271   :  { %2406 = vsyncpa [#allocation7], 1 }
0x1272   :  { %2408 = vsyncpa [#allocation7 + $0x1], 1 }

</bundles_post_ra>
